<compile_context>
chip_gen: v7x
topology: tpu7x:2x2x1
jax: 0.10.0
libtpu: 0.0.40
codegen_flags: <defaults>
</compile_context>

<pallas_src>
import math

import jax
import jax.numpy as jnp
from jax.experimental import pallas as pl
from jax.experimental.pallas import tpu as pltpu

# ----------------------------- small BERT config -----------------------------
BATCH = 2
SEQ = 8
HIDDEN = 32
NUM_HEADS = 2
HEAD_DIM = HIDDEN // NUM_HEADS
INTERMEDIATE = 64
NUM_LAYERS = 2
VOCAB = 128
MAX_POS = 16
TYPE_VOCAB = 2
NUM_CLASSES = 16
LN_EPS = 1e-12            # BERT LayerNorm epsilon
ROWS = BATCH * SEQ        # flattened (batch*seq) rows

WEIGHT_DTYPE = jnp.bfloat16   # MXU operand dtype (f32 accumulation everywhere)


# ------------------------------ in-kernel helpers ----------------------------
def _layer_norm(x, gamma, beta):
    """LayerNorm over the last (hidden) axis; gamma/beta are (1, H) f32."""
    mean = jnp.mean(x, axis=-1, keepdims=True)
    var = jnp.mean(jnp.square(x - mean), axis=-1, keepdims=True)
    inv = jax.lax.rsqrt(var + LN_EPS)
    return (x - mean) * inv * gamma + beta


def _gelu(x):
    # TODO(synk): HF BERT's default "gelu" is the exact erf-based GELU; erf
    # lowering in Mosaic is not guaranteed, so use the tanh approximation.
    c = math.sqrt(2.0 / math.pi)
    return 0.5 * x * (1.0 + jnp.tanh(c * (x + 0.044715 * x * x * x)))


# --------------------------------- fused kernel -------------------------------
def _bert_fused_kernel(
    ids_ref, word_emb_ref, pos_type_ref, emb_g_ref, emb_b_ref,
    wqkv_ref, bqkv_ref, wo_ref, bo_ref, ln1g_ref, ln1b_ref,
    w1_ref, b1_ref, w2_ref, b2_ref, ln2g_ref, ln2b_ref,
    pool_w_ref, pool_b_ref, clf_w_ref, clf_b_ref,
    o_ref,
    ctx_scratch,
):
    # ---------------- embeddings: one-hot gather on the MXU ------------------
    ids = ids_ref[...]                                               # (R, 1) i32
    vocab_iota = jax.lax.broadcasted_iota(jnp.int32, (ROWS, VOCAB), 1)
    onehot = (ids == vocab_iota).astype(WEIGHT_DTYPE)                # (R, V)
    emb = jnp.dot(onehot, word_emb_ref[...],
                  preferred_element_type=jnp.float32)                # (R, H) f32
    emb = emb + pos_type_ref[...]                                    # + pos/type
    x = _layer_norm(emb, emb_g_ref[...], emb_b_ref[...])             # (R, H) f32

    scale = 1.0 / math.sqrt(HEAD_DIM)
    for l in range(NUM_LAYERS):                    # static unrolled layer loop
        # ---- fused QKV projection: one (R, H) @ (H, 3H) dot ----
        qkv = jnp.dot(x.astype(WEIGHT_DTYPE), wqkv_ref[l],
                      preferred_element_type=jnp.float32) + bqkv_ref[l]
        q = qkv[:, 0 * HIDDEN:1 * HIDDEN]
        k = qkv[:, 1 * HIDDEN:2 * HIDDEN]
        v = qkv[:, 2 * HIDDEN:3 * HIDDEN]

        # ---- per-(batch, head) attention; contexts go straight into a VMEM
        #      scratch at static offsets (no lane-axis concatenate) ----
        for b in range(BATCH):
            rsl = slice(b * SEQ, (b + 1) * SEQ)
            for h in range(NUM_HEADS):
                csl = slice(h * HEAD_DIM, (h + 1) * HEAD_DIM)
                qh = q[rsl, csl].astype(WEIGHT_DTYPE)                # (S, hd)
                kh = k[rsl, csl].astype(WEIGHT_DTYPE)
                vh = v[rsl, csl].astype(WEIGHT_DTYPE)
                s = jnp.dot(qh, kh.T, preferred_element_type=jnp.float32) * scale
                s = s - jnp.max(s, axis=-1, keepdims=True)
                p = jnp.exp(s)                                       # (S, S) f32
                denom = jnp.sum(p, axis=-1, keepdims=True)           # (S, 1)
                ctx = jnp.dot(p.astype(WEIGHT_DTYPE), vh,
                              preferred_element_type=jnp.float32)    # (S, hd)
                # normalize after the small dot: reciprocal goes to the EUP
                ctx_scratch[rsl, csl] = ctx * pl.reciprocal(denom, approx=True)

        ctx_all = ctx_scratch[...]                                   # (R, H) f32

        # ---- attention output projection + post-LN residual ----
        attn = jnp.dot(ctx_all.astype(WEIGHT_DTYPE), wo_ref[l],
                       preferred_element_type=jnp.float32) + bo_ref[l]
        h1 = _layer_norm(attn + x, ln1g_ref[l], ln1b_ref[l])

        # ---- FFN ----
        ff = jnp.dot(h1.astype(WEIGHT_DTYPE), w1_ref[l],
                     preferred_element_type=jnp.float32) + b1_ref[l]
        ff = _gelu(ff)
        ff = jnp.dot(ff.astype(WEIGHT_DTYPE), w2_ref[l],
                     preferred_element_type=jnp.float32) + b2_ref[l]
        x = _layer_norm(ff + h1, ln2g_ref[l], ln2b_ref[l])

    # ---------------- pooler (tanh dense on [CLS]) + classifier --------------
    cls_rows = jnp.concatenate(
        [x[b * SEQ:b * SEQ + 1, :] for b in range(BATCH)], axis=0)   # (B, H)
    pooled = jnp.tanh(
        jnp.dot(cls_rows.astype(WEIGHT_DTYPE), pool_w_ref[...],
                preferred_element_type=jnp.float32) + pool_b_ref[...])
    o_ref[...] = (
        jnp.dot(pooled.astype(WEIGHT_DTYPE), clf_w_ref[...],
                preferred_element_type=jnp.float32) + clf_b_ref[...])


# ------------------------------ pallas wrapper --------------------------------
def bert_forward(params, input_ids):
    """input_ids: (B, S) int32 token ids -> (B, NUM_CLASSES) f32 logits."""
    B, S = input_ids.shape
    ids = input_ids.reshape(B * S, 1).astype(jnp.int32)
    # token_type_ids default to 0 and position_ids to arange(S): fold both
    # constant embedding terms into one (B*S, H) additive table (pure
    # parameter preprocessing, no activation round trip).
    pos_type = jnp.tile(params["pos_emb"][:S] + params["type_emb"][0:1], (B, 1))

    args = (
        ids, params["word_emb"], pos_type,
        params["emb_ln_g"], params["emb_ln_b"],
        params["wqkv"], params["bqkv"], params["wo"], params["bo"],
        params["ln1_g"], params["ln1_b"],
        params["w1"], params["b1"], params["w2"], params["b2"],
        params["ln2_g"], params["ln2_b"],
        params["pool_w"], params["pool_b"],
        params["cls_w"], params["cls_b"],
    )
    # Single fused call, no grid: everything fits in VMEM, one kernel launch.
    return pl.pallas_call(
        _bert_fused_kernel,
        out_shape=jax.ShapeDtypeStruct((B, NUM_CLASSES), jnp.float32),
        scratch_shapes=[pltpu.VMEM((B * S, HIDDEN), jnp.float32)],
    )(*args)


# -------------------------------- parameters ----------------------------------
def init_params(key):
    keys = iter(jax.random.split(key, 32))

    def dense(shape, dtype=jnp.float32):
        return (0.02 * jax.random.normal(next(keys), shape, jnp.float32)).astype(dtype)

    def zeros(shape):
        return jnp.zeros(shape, jnp.float32)

    def ones(shape):
        return jnp.ones(shape, jnp.float32)

    L = NUM_LAYERS
    params = {
        # embeddings
        "word_emb": dense((VOCAB, HIDDEN), WEIGHT_DTYPE),
        "pos_emb": dense((MAX_POS, HIDDEN)),
        "type_emb": dense((TYPE_VOCAB, HIDDEN)),
        "emb_ln_g": ones((1, HIDDEN)),
        "emb_ln_b": zeros((1, HIDDEN)),
        # encoder layers, stacked along a leading NUM_LAYERS axis
        "wqkv": dense((L, HIDDEN, 3 * HIDDEN), WEIGHT_DTYPE),   # fused Q|K|V
        "bqkv": zeros((L, 1, 3 * HIDDEN)),
        "wo": dense((L, HIDDEN, HIDDEN), WEIGHT_DTYPE),
        "bo": zeros((L, 1, HIDDEN)),
        "ln1_g": ones((L, 1, HIDDEN)),
        "ln1_b": zeros((L, 1, HIDDEN)),
        "w1": dense((L, HIDDEN, INTERMEDIATE), WEIGHT_DTYPE),
        "b1": zeros((L, 1, INTERMEDIATE)),
        "w2": dense((L, INTERMEDIATE, HIDDEN), WEIGHT_DTYPE),
        "b2": zeros((L, 1, HIDDEN)),
        "ln2_g": ones((L, 1, HIDDEN)),
        "ln2_b": zeros((L, 1, HIDDEN)),
        # pooler + classification head
        "pool_w": dense((HIDDEN, HIDDEN), WEIGHT_DTYPE),
        "pool_b": zeros((1, HIDDEN)),
        "cls_w": dense((HIDDEN, NUM_CLASSES), WEIGHT_DTYPE),
        "cls_b": zeros((1, NUM_CLASSES)),
    }
    return params


if __name__ == "__main__":
    key = jax.random.PRNGKey(0)
    pkey, dkey = jax.random.split(key)
    params = init_params(pkey)
    input_ids = jax.random.randint(dkey, (BATCH, SEQ), 0, VOCAB, dtype=jnp.int32)

    logits = jax.jit(bert_forward)(params, input_ids)
    jax.block_until_ready(logits)

    assert logits.shape == (BATCH, NUM_CLASSES), logits.shape
    assert logits.dtype == jnp.float32
    assert bool(jnp.all(jnp.isfinite(logits)))
    print("KERNEL_OK")
</pallas_src>

<mosaic_0001>
module attributes {stable_mosaic.version = 11 : i64} {
  func.func @_bert_fused_kernel(%arg0: memref<16x1xi32, #tpu.memory_space<vmem>>, %arg1: memref<128x32xbf16, #tpu.memory_space<vmem>>, %arg2: memref<16x32xf32, #tpu.memory_space<vmem>>, %arg3: memref<1x32xf32, #tpu.memory_space<vmem>>, %arg4: memref<1x32xf32, #tpu.memory_space<vmem>>, %arg5: memref<2x32x96xbf16, #tpu.memory_space<vmem>>, %arg6: memref<2x1x96xf32, #tpu.memory_space<vmem>>, %arg7: memref<2x32x32xbf16, #tpu.memory_space<vmem>>, %arg8: memref<2x1x32xf32, #tpu.memory_space<vmem>>, %arg9: memref<2x1x32xf32, #tpu.memory_space<vmem>>, %arg10: memref<2x1x32xf32, #tpu.memory_space<vmem>>, %arg11: memref<2x32x64xbf16, #tpu.memory_space<vmem>>, %arg12: memref<2x1x64xf32, #tpu.memory_space<vmem>>, %arg13: memref<2x64x32xbf16, #tpu.memory_space<vmem>>, %arg14: memref<2x1x32xf32, #tpu.memory_space<vmem>>, %arg15: memref<2x1x32xf32, #tpu.memory_space<vmem>>, %arg16: memref<2x1x32xf32, #tpu.memory_space<vmem>>, %arg17: memref<32x32xbf16, #tpu.memory_space<vmem>>, %arg18: memref<1x32xf32, #tpu.memory_space<vmem>>, %arg19: memref<32x16xbf16, #tpu.memory_space<vmem>>, %arg20: memref<1x16xf32, #tpu.memory_space<vmem>>, %arg21: memref<2x16xf32, #tpu.memory_space<vmem>>, %arg22: memref<16x32xf32, #tpu.memory_space<vmem>>) attributes {dimension_semantics = [], scalar_prefetch = 0 : i64, scratch_operands = 1 : i64, tpu.core_type = #tpu.core_type<tc>} {
    %c0 = arith.constant 0 : index
    %c0_0 = arith.constant 0 : index
    %0 = vector.load %arg0[%c0, %c0_0] : memref<16x1xi32, #tpu.memory_space<vmem>>, vector<16x1xi32>
    %1 = tpu.iota {dimensions = array<i32: 1>} : vector<16x128xi32>
    %2 = vector.broadcast %0 : vector<16x1xi32> to vector<16x128xi32>
    %3 = arith.cmpi eq, %2, %1 : vector<16x128xi32>
    %4 = arith.extui %3 : vector<16x128xi1> to vector<16x128xi32>
    %5 = arith.sitofp %4 : vector<16x128xi32> to vector<16x128xf32>
    %6 = arith.truncf %5 : vector<16x128xf32> to vector<16x128xbf16>
    %c0_1 = arith.constant 0 : index
    %c0_2 = arith.constant 0 : index
    %7 = vector.load %arg1[%c0_1, %c0_2] : memref<128x32xbf16, #tpu.memory_space<vmem>>, vector<128x32xbf16>
    %cst = arith.constant dense<0.000000e+00> : vector<16x32xf32>
    %8 = tpu.matmul %6, %7, %cst {dimension_numbers = #tpu.dot_dimension_numbers<[1], [0], [0], [1], [0, 0, 1, 1], [], []>} : vector<16x128xbf16>, vector<128x32xbf16>, vector<16x32xf32> -> vector<16x32xf32>
    %c0_3 = arith.constant 0 : index
    %c0_4 = arith.constant 0 : index
    %9 = vector.load %arg2[%c0_3, %c0_4] : memref<16x32xf32, #tpu.memory_space<vmem>>, vector<16x32xf32>
    %10 = arith.addf %8, %9 : vector<16x32xf32>
    %c0_5 = arith.constant 0 : index
    %c0_6 = arith.constant 0 : index
    %11 = vector.load %arg3[%c0_5, %c0_6] : memref<1x32xf32, #tpu.memory_space<vmem>>, vector<1x32xf32>
    %c0_7 = arith.constant 0 : index
    %c0_8 = arith.constant 0 : index
    %12 = vector.load %arg4[%c0_7, %c0_8] : memref<1x32xf32, #tpu.memory_space<vmem>>, vector<1x32xf32>
    %cst_9 = arith.constant dense<0.000000e+00> : vector<16xf32>
    %13 = vector.multi_reduction <add>, %10, %cst_9 [1] : vector<16x32xf32> to vector<16xf32>
    %14 = vector.shape_cast %13 : vector<16xf32> to vector<16x1xf32>
    %cst_10 = arith.constant 3.200000e+01 : f32
    %15 = vector.broadcast %cst_10 : f32 to vector<16x1xf32>
    %16 = arith.divf %14, %15 : vector<16x1xf32>
    %17 = vector.broadcast %16 : vector<16x1xf32> to vector<16x32xf32>
    %18 = arith.subf %10, %17 : vector<16x32xf32>
    %19 = arith.mulf %18, %18 : vector<16x32xf32>
    %cst_11 = arith.constant dense<0.000000e+00> : vector<16xf32>
    %20 = vector.multi_reduction <add>, %19, %cst_11 [1] : vector<16x32xf32> to vector<16xf32>
    %21 = vector.shape_cast %20 : vector<16xf32> to vector<16x1xf32>
    %cst_12 = arith.constant 3.200000e+01 : f32
    %22 = vector.broadcast %cst_12 : f32 to vector<16x1xf32>
    %23 = arith.divf %21, %22 : vector<16x1xf32>
    %cst_13 = arith.constant 9.99999996E-13 : f32
    %24 = vector.broadcast %cst_13 : f32 to vector<16x1xf32>
    %25 = arith.addf %23, %24 : vector<16x1xf32>
    %26 = math.rsqrt %25 : vector<16x1xf32>
    %27 = vector.broadcast %16 : vector<16x1xf32> to vector<16x32xf32>
    %28 = arith.subf %10, %27 : vector<16x32xf32>
    %29 = vector.broadcast %26 : vector<16x1xf32> to vector<16x32xf32>
    %30 = arith.mulf %28, %29 : vector<16x32xf32>
    %31 = vector.broadcast %11 : vector<1x32xf32> to vector<16x32xf32>
    %32 = arith.mulf %30, %31 : vector<16x32xf32>
    %33 = vector.broadcast %12 : vector<1x32xf32> to vector<16x32xf32>
    %34 = arith.addf %32, %33 : vector<16x32xf32>
    %35 = arith.truncf %34 : vector<16x32xf32> to vector<16x32xbf16>
    %c0_14 = arith.constant 0 : index
    %c0_15 = arith.constant 0 : index
    %c0_16 = arith.constant 0 : index
    %36 = vector.load %arg5[%c0_14, %c0_15, %c0_16] : memref<2x32x96xbf16, #tpu.memory_space<vmem>>, vector<1x32x96xbf16>
    %37 = vector.shape_cast %36 : vector<1x32x96xbf16> to vector<32x96xbf16>
    %cst_17 = arith.constant dense<0.000000e+00> : vector<16x96xf32>
    %38 = tpu.matmul %35, %37, %cst_17 {dimension_numbers = #tpu.dot_dimension_numbers<[1], [0], [0], [1], [0, 0, 1, 1], [], []>} : vector<16x32xbf16>, vector<32x96xbf16>, vector<16x96xf32> -> vector<16x96xf32>
    %c0_18 = arith.constant 0 : index
    %c0_19 = arith.constant 0 : index
    %c0_20 = arith.constant 0 : index
    %39 = vector.load %arg6[%c0_18, %c0_19, %c0_20] : memref<2x1x96xf32, #tpu.memory_space<vmem>>, vector<1x1x96xf32>
    %40 = vector.shape_cast %39 : vector<1x1x96xf32> to vector<1x96xf32>
    %41 = vector.broadcast %40 : vector<1x96xf32> to vector<16x96xf32>
    %42 = arith.addf %38, %41 : vector<16x96xf32>
    %43 = vector.extract_strided_slice %42 {offsets = [0, 0], sizes = [16, 32], strides = [1, 1]} : vector<16x96xf32> to vector<16x32xf32>
    %44 = vector.extract_strided_slice %42 {offsets = [0, 32], sizes = [16, 32], strides = [1, 1]} : vector<16x96xf32> to vector<16x32xf32>
    %45 = vector.extract_strided_slice %42 {offsets = [0, 64], sizes = [16, 32], strides = [1, 1]} : vector<16x96xf32> to vector<16x32xf32>
    %46 = vector.extract_strided_slice %43 {offsets = [0, 0], sizes = [8, 16], strides = [1, 1]} : vector<16x32xf32> to vector<8x16xf32>
    %47 = arith.truncf %46 : vector<8x16xf32> to vector<8x16xbf16>
    %48 = vector.extract_strided_slice %44 {offsets = [0, 0], sizes = [8, 16], strides = [1, 1]} : vector<16x32xf32> to vector<8x16xf32>
    %49 = arith.truncf %48 : vector<8x16xf32> to vector<8x16xbf16>
    %50 = vector.extract_strided_slice %45 {offsets = [0, 0], sizes = [8, 16], strides = [1, 1]} : vector<16x32xf32> to vector<8x16xf32>
    %51 = arith.truncf %50 : vector<8x16xf32> to vector<8x16xbf16>
    %52 = tpu.transpose %49, [1, 0] : vector<8x16xbf16> -> vector<16x8xbf16>
    %cst_21 = arith.constant dense<0.000000e+00> : vector<8x8xf32>
    %53 = tpu.matmul %47, %52, %cst_21 {dimension_numbers = #tpu.dot_dimension_numbers<[1], [0], [0], [1], [0, 0, 1, 1], [], []>} : vector<8x16xbf16>, vector<16x8xbf16>, vector<8x8xf32> -> vector<8x8xf32>
    %cst_22 = arith.constant 2.500000e-01 : f32
    %54 = vector.broadcast %cst_22 : f32 to vector<8x8xf32>
    %55 = arith.mulf %53, %54 : vector<8x8xf32>
    %cst_23 = arith.constant dense<0xFF800000> : vector<8xf32>
    %56 = vector.multi_reduction <maximumf>, %55, %cst_23 [1] : vector<8x8xf32> to vector<8xf32>
    %57 = vector.shape_cast %56 : vector<8xf32> to vector<8x1xf32>
    %58 = vector.broadcast %57 : vector<8x1xf32> to vector<8x8xf32>
    %59 = arith.subf %55, %58 : vector<8x8xf32>
    %60 = math.exp %59 : vector<8x8xf32>
    %cst_24 = arith.constant dense<0.000000e+00> : vector<8xf32>
    %61 = vector.multi_reduction <add>, %60, %cst_24 [1] : vector<8x8xf32> to vector<8xf32>
    %62 = vector.shape_cast %61 : vector<8xf32> to vector<8x1xf32>
    %63 = arith.truncf %60 : vector<8x8xf32> to vector<8x8xbf16>
    %cst_25 = arith.constant dense<0.000000e+00> : vector<8x16xf32>
    %64 = tpu.matmul %63, %51, %cst_25 {dimension_numbers = #tpu.dot_dimension_numbers<[1], [0], [0], [1], [0, 0, 1, 1], [], []>} : vector<8x8xbf16>, vector<8x16xbf16>, vector<8x16xf32> -> vector<8x16xf32>
    %65 = tpu.reciprocal %62 {approx = true} : vector<8x1xf32> -> vector<8x1xf32>
    %66 = vector.broadcast %65 : vector<8x1xf32> to vector<8x16xf32>
    %67 = arith.mulf %64, %66 : vector<8x16xf32>
    %c0_26 = arith.constant 0 : index
    %c0_27 = arith.constant 0 : index
    %68 = vector.load %arg22[%c0_26, %c0_27] : memref<16x32xf32, #tpu.memory_space<vmem>>, vector<8x16xf32>
    tpu.vector_store %arg22[%c0_26, %c0_27], %67 {strides = array<i32>} : memref<16x32xf32, #tpu.memory_space<vmem>>, vector<8x16xf32>,
    %69 = vector.extract_strided_slice %43 {offsets = [0, 16], sizes = [8, 16], strides = [1, 1]} : vector<16x32xf32> to vector<8x16xf32>
    %70 = arith.truncf %69 : vector<8x16xf32> to vector<8x16xbf16>
    %71 = vector.extract_strided_slice %44 {offsets = [0, 16], sizes = [8, 16], strides = [1, 1]} : vector<16x32xf32> to vector<8x16xf32>
    %72 = arith.truncf %71 : vector<8x16xf32> to vector<8x16xbf16>
    %73 = vector.extract_strided_slice %45 {offsets = [0, 16], sizes = [8, 16], strides = [1, 1]} : vector<16x32xf32> to vector<8x16xf32>
    %74 = arith.truncf %73 : vector<8x16xf32> to vector<8x16xbf16>
    %75 = tpu.transpose %72, [1, 0] : vector<8x16xbf16> -> vector<16x8xbf16>
    %cst_28 = arith.constant dense<0.000000e+00> : vector<8x8xf32>
    %76 = tpu.matmul %70, %75, %cst_28 {dimension_numbers = #tpu.dot_dimension_numbers<[1], [0], [0], [1], [0, 0, 1, 1], [], []>} : vector<8x16xbf16>, vector<16x8xbf16>, vector<8x8xf32> -> vector<8x8xf32>
    %cst_29 = arith.constant 2.500000e-01 : f32
    %77 = vector.broadcast %cst_29 : f32 to vector<8x8xf32>
    %78 = arith.mulf %76, %77 : vector<8x8xf32>
    %cst_30 = arith.constant dense<0xFF800000> : vector<8xf32>
    %79 = vector.multi_reduction <maximumf>, %78, %cst_30 [1] : vector<8x8xf32> to vector<8xf32>
    %80 = vector.shape_cast %79 : vector<8xf32> to vector<8x1xf32>
    %81 = vector.broadcast %80 : vector<8x1xf32> to vector<8x8xf32>
    %82 = arith.subf %78, %81 : vector<8x8xf32>
    %83 = math.exp %82 : vector<8x8xf32>
    %cst_31 = arith.constant dense<0.000000e+00> : vector<8xf32>
    %84 = vector.multi_reduction <add>, %83, %cst_31 [1] : vector<8x8xf32> to vector<8xf32>
    %85 = vector.shape_cast %84 : vector<8xf32> to vector<8x1xf32>
    %86 = arith.truncf %83 : vector<8x8xf32> to vector<8x8xbf16>
    %cst_32 = arith.constant dense<0.000000e+00> : vector<8x16xf32>
    %87 = tpu.matmul %86, %74, %cst_32 {dimension_numbers = #tpu.dot_dimension_numbers<[1], [0], [0], [1], [0, 0, 1, 1], [], []>} : vector<8x8xbf16>, vector<8x16xbf16>, vector<8x16xf32> -> vector<8x16xf32>
    %88 = tpu.reciprocal %85 {approx = true} : vector<8x1xf32> -> vector<8x1xf32>
    %89 = vector.broadcast %88 : vector<8x1xf32> to vector<8x16xf32>
    %90 = arith.mulf %87, %89 : vector<8x16xf32>
    %c0_33 = arith.constant 0 : index
    %c16 = arith.constant 16 : index
    %91 = vector.load %arg22[%c0_33, %c16] : memref<16x32xf32, #tpu.memory_space<vmem>>, vector<8x16xf32>
    tpu.vector_store %arg22[%c0_33, %c16], %90 {strides = array<i32>} : memref<16x32xf32, #tpu.memory_space<vmem>>, vector<8x16xf32>,
    %92 = vector.extract_strided_slice %43 {offsets = [8, 0], sizes = [8, 16], strides = [1, 1]} : vector<16x32xf32> to vector<8x16xf32>
    %93 = arith.truncf %92 : vector<8x16xf32> to vector<8x16xbf16>
    %94 = vector.extract_strided_slice %44 {offsets = [8, 0], sizes = [8, 16], strides = [1, 1]} : vector<16x32xf32> to vector<8x16xf32>
    %95 = arith.truncf %94 : vector<8x16xf32> to vector<8x16xbf16>
    %96 = vector.extract_strided_slice %45 {offsets = [8, 0], sizes = [8, 16], strides = [1, 1]} : vector<16x32xf32> to vector<8x16xf32>
    %97 = arith.truncf %96 : vector<8x16xf32> to vector<8x16xbf16>
    %98 = tpu.transpose %95, [1, 0] : vector<8x16xbf16> -> vector<16x8xbf16>
    %cst_34 = arith.constant dense<0.000000e+00> : vector<8x8xf32>
    %99 = tpu.matmul %93, %98, %cst_34 {dimension_numbers = #tpu.dot_dimension_numbers<[1], [0], [0], [1], [0, 0, 1, 1], [], []>} : vector<8x16xbf16>, vector<16x8xbf16>, vector<8x8xf32> -> vector<8x8xf32>
    %cst_35 = arith.constant 2.500000e-01 : f32
    %100 = vector.broadcast %cst_35 : f32 to vector<8x8xf32>
    %101 = arith.mulf %99, %100 : vector<8x8xf32>
    %cst_36 = arith.constant dense<0xFF800000> : vector<8xf32>
    %102 = vector.multi_reduction <maximumf>, %101, %cst_36 [1] : vector<8x8xf32> to vector<8xf32>
    %103 = vector.shape_cast %102 : vector<8xf32> to vector<8x1xf32>
    %104 = vector.broadcast %103 : vector<8x1xf32> to vector<8x8xf32>
    %105 = arith.subf %101, %104 : vector<8x8xf32>
    %106 = math.exp %105 : vector<8x8xf32>
    %cst_37 = arith.constant dense<0.000000e+00> : vector<8xf32>
    %107 = vector.multi_reduction <add>, %106, %cst_37 [1] : vector<8x8xf32> to vector<8xf32>
    %108 = vector.shape_cast %107 : vector<8xf32> to vector<8x1xf32>
    %109 = arith.truncf %106 : vector<8x8xf32> to vector<8x8xbf16>
    %cst_38 = arith.constant dense<0.000000e+00> : vector<8x16xf32>
    %110 = tpu.matmul %109, %97, %cst_38 {dimension_numbers = #tpu.dot_dimension_numbers<[1], [0], [0], [1], [0, 0, 1, 1], [], []>} : vector<8x8xbf16>, vector<8x16xbf16>, vector<8x16xf32> -> vector<8x16xf32>
    %111 = tpu.reciprocal %108 {approx = true} : vector<8x1xf32> -> vector<8x1xf32>
    %112 = vector.broadcast %111 : vector<8x1xf32> to vector<8x16xf32>
    %113 = arith.mulf %110, %112 : vector<8x16xf32>
    %c8 = arith.constant 8 : index
    %c0_39 = arith.constant 0 : index
    %114 = vector.load %arg22[%c8, %c0_39] : memref<16x32xf32, #tpu.memory_space<vmem>>, vector<8x16xf32>
    tpu.vector_store %arg22[%c8, %c0_39], %113 {strides = array<i32>} : memref<16x32xf32, #tpu.memory_space<vmem>>, vector<8x16xf32>,
    %115 = vector.extract_strided_slice %43 {offsets = [8, 16], sizes = [8, 16], strides = [1, 1]} : vector<16x32xf32> to vector<8x16xf32>
    %116 = arith.truncf %115 : vector<8x16xf32> to vector<8x16xbf16>
    %117 = vector.extract_strided_slice %44 {offsets = [8, 16], sizes = [8, 16], strides = [1, 1]} : vector<16x32xf32> to vector<8x16xf32>
    %118 = arith.truncf %117 : vector<8x16xf32> to vector<8x16xbf16>
    %119 = vector.extract_strided_slice %45 {offsets = [8, 16], sizes = [8, 16], strides = [1, 1]} : vector<16x32xf32> to vector<8x16xf32>
    %120 = arith.truncf %119 : vector<8x16xf32> to vector<8x16xbf16>
    %121 = tpu.transpose %118, [1, 0] : vector<8x16xbf16> -> vector<16x8xbf16>
    %cst_40 = arith.constant dense<0.000000e+00> : vector<8x8xf32>
    %122 = tpu.matmul %116, %121, %cst_40 {dimension_numbers = #tpu.dot_dimension_numbers<[1], [0], [0], [1], [0, 0, 1, 1], [], []>} : vector<8x16xbf16>, vector<16x8xbf16>, vector<8x8xf32> -> vector<8x8xf32>
    %cst_41 = arith.constant 2.500000e-01 : f32
    %123 = vector.broadcast %cst_41 : f32 to vector<8x8xf32>
    %124 = arith.mulf %122, %123 : vector<8x8xf32>
    %cst_42 = arith.constant dense<0xFF800000> : vector<8xf32>
    %125 = vector.multi_reduction <maximumf>, %124, %cst_42 [1] : vector<8x8xf32> to vector<8xf32>
    %126 = vector.shape_cast %125 : vector<8xf32> to vector<8x1xf32>
    %127 = vector.broadcast %126 : vector<8x1xf32> to vector<8x8xf32>
    %128 = arith.subf %124, %127 : vector<8x8xf32>
    %129 = math.exp %128 : vector<8x8xf32>
    %cst_43 = arith.constant dense<0.000000e+00> : vector<8xf32>
    %130 = vector.multi_reduction <add>, %129, %cst_43 [1] : vector<8x8xf32> to vector<8xf32>
    %131 = vector.shape_cast %130 : vector<8xf32> to vector<8x1xf32>
    %132 = arith.truncf %129 : vector<8x8xf32> to vector<8x8xbf16>
    %cst_44 = arith.constant dense<0.000000e+00> : vector<8x16xf32>
    %133 = tpu.matmul %132, %120, %cst_44 {dimension_numbers = #tpu.dot_dimension_numbers<[1], [0], [0], [1], [0, 0, 1, 1], [], []>} : vector<8x8xbf16>, vector<8x16xbf16>, vector<8x16xf32> -> vector<8x16xf32>
    %134 = tpu.reciprocal %131 {approx = true} : vector<8x1xf32> -> vector<8x1xf32>
    %135 = vector.broadcast %134 : vector<8x1xf32> to vector<8x16xf32>
    %136 = arith.mulf %133, %135 : vector<8x16xf32>
    %c8_45 = arith.constant 8 : index
    %c16_46 = arith.constant 16 : index
    %137 = vector.load %arg22[%c8_45, %c16_46] : memref<16x32xf32, #tpu.memory_space<vmem>>, vector<8x16xf32>
    tpu.vector_store %arg22[%c8_45, %c16_46], %136 {strides = array<i32>} : memref<16x32xf32, #tpu.memory_space<vmem>>, vector<8x16xf32>,
    %c0_47 = arith.constant 0 : index
    %c0_48 = arith.constant 0 : index
    %138 = vector.load %arg22[%c0_47, %c0_48] : memref<16x32xf32, #tpu.memory_space<vmem>>, vector<16x32xf32>
    %139 = arith.truncf %138 : vector<16x32xf32> to vector<16x32xbf16>
    %c0_49 = arith.constant 0 : index
    %c0_50 = arith.constant 0 : index
    %c0_51 = arith.constant 0 : index
    %140 = vector.load %arg7[%c0_49, %c0_50, %c0_51] : memref<2x32x32xbf16, #tpu.memory_space<vmem>>, vector<1x32x32xbf16>
    %141 = vector.shape_cast %140 : vector<1x32x32xbf16> to vector<32x32xbf16>
    %cst_52 = arith.constant dense<0.000000e+00> : vector<16x32xf32>
    %142 = tpu.matmul %139, %141, %cst_52 {dimension_numbers = #tpu.dot_dimension_numbers<[1], [0], [0], [1], [0, 0, 1, 1], [], []>} : vector<16x32xbf16>, vector<32x32xbf16>, vector<16x32xf32> -> vector<16x32xf32>
    %c0_53 = arith.constant 0 : index
    %c0_54 = arith.constant 0 : index
    %c0_55 = arith.constant 0 : index
    %143 = vector.load %arg8[%c0_53, %c0_54, %c0_55] : memref<2x1x32xf32, #tpu.memory_space<vmem>>, vector<1x1x32xf32>
    %144 = vector.shape_cast %143 : vector<1x1x32xf32> to vector<1x32xf32>
    %145 = vector.broadcast %144 : vector<1x32xf32> to vector<16x32xf32>
    %146 = arith.addf %142, %145 : vector<16x32xf32>
    %147 = arith.addf %146, %34 : vector<16x32xf32>
    %c0_56 = arith.constant 0 : index
    %c0_57 = arith.constant 0 : index
    %c0_58 = arith.constant 0 : index
    %148 = vector.load %arg9[%c0_56, %c0_57, %c0_58] : memref<2x1x32xf32, #tpu.memory_space<vmem>>, vector<1x1x32xf32>
    %149 = vector.shape_cast %148 : vector<1x1x32xf32> to vector<1x32xf32>
    %c0_59 = arith.constant 0 : index
    %c0_60 = arith.constant 0 : index
    %c0_61 = arith.constant 0 : index
    %150 = vector.load %arg10[%c0_59, %c0_60, %c0_61] : memref<2x1x32xf32, #tpu.memory_space<vmem>>, vector<1x1x32xf32>
    %151 = vector.shape_cast %150 : vector<1x1x32xf32> to vector<1x32xf32>
    %cst_62 = arith.constant dense<0.000000e+00> : vector<16xf32>
    %152 = vector.multi_reduction <add>, %147, %cst_62 [1] : vector<16x32xf32> to vector<16xf32>
    %153 = vector.shape_cast %152 : vector<16xf32> to vector<16x1xf32>
    %cst_63 = arith.constant 3.200000e+01 : f32
    %154 = vector.broadcast %cst_63 : f32 to vector<16x1xf32>
    %155 = arith.divf %153, %154 : vector<16x1xf32>
    %156 = vector.broadcast %155 : vector<16x1xf32> to vector<16x32xf32>
    %157 = arith.subf %147, %156 : vector<16x32xf32>
    %158 = arith.mulf %157, %157 : vector<16x32xf32>
    %cst_64 = arith.constant dense<0.000000e+00> : vector<16xf32>
    %159 = vector.multi_reduction <add>, %158, %cst_64 [1] : vector<16x32xf32> to vector<16xf32>
    %160 = vector.shape_cast %159 : vector<16xf32> to vector<16x1xf32>
    %cst_65 = arith.constant 3.200000e+01 : f32
    %161 = vector.broadcast %cst_65 : f32 to vector<16x1xf32>
    %162 = arith.divf %160, %161 : vector<16x1xf32>
    %cst_66 = arith.constant 9.99999996E-13 : f32
    %163 = vector.broadcast %cst_66 : f32 to vector<16x1xf32>
    %164 = arith.addf %162, %163 : vector<16x1xf32>
    %165 = math.rsqrt %164 : vector<16x1xf32>
    %166 = vector.broadcast %155 : vector<16x1xf32> to vector<16x32xf32>
    %167 = arith.subf %147, %166 : vector<16x32xf32>
    %168 = vector.broadcast %165 : vector<16x1xf32> to vector<16x32xf32>
    %169 = arith.mulf %167, %168 : vector<16x32xf32>
    %170 = vector.broadcast %149 : vector<1x32xf32> to vector<16x32xf32>
    %171 = arith.mulf %169, %170 : vector<16x32xf32>
    %172 = vector.broadcast %151 : vector<1x32xf32> to vector<16x32xf32>
    %173 = arith.addf %171, %172 : vector<16x32xf32>
    %174 = arith.truncf %173 : vector<16x32xf32> to vector<16x32xbf16>
    %c0_67 = arith.constant 0 : index
    %c0_68 = arith.constant 0 : index
    %c0_69 = arith.constant 0 : index
    %175 = vector.load %arg11[%c0_67, %c0_68, %c0_69] : memref<2x32x64xbf16, #tpu.memory_space<vmem>>, vector<1x32x64xbf16>
    %176 = vector.shape_cast %175 : vector<1x32x64xbf16> to vector<32x64xbf16>
    %cst_70 = arith.constant dense<0.000000e+00> : vector<16x64xf32>
    %177 = tpu.matmul %174, %176, %cst_70 {dimension_numbers = #tpu.dot_dimension_numbers<[1], [0], [0], [1], [0, 0, 1, 1], [], []>} : vector<16x32xbf16>, vector<32x64xbf16>, vector<16x64xf32> -> vector<16x64xf32>
    %c0_71 = arith.constant 0 : index
    %c0_72 = arith.constant 0 : index
    %c0_73 = arith.constant 0 : index
    %178 = vector.load %arg12[%c0_71, %c0_72, %c0_73] : memref<2x1x64xf32, #tpu.memory_space<vmem>>, vector<1x1x64xf32>
    %179 = vector.shape_cast %178 : vector<1x1x64xf32> to vector<1x64xf32>
    %180 = vector.broadcast %179 : vector<1x64xf32> to vector<16x64xf32>
    %181 = arith.addf %177, %180 : vector<16x64xf32>
    %cst_74 = arith.constant 5.000000e-01 : f32
    %182 = vector.broadcast %cst_74 : f32 to vector<16x64xf32>
    %183 = arith.mulf %182, %181 : vector<16x64xf32>
    %cst_75 = arith.constant 4.471500e-02 : f32
    %184 = vector.broadcast %cst_75 : f32 to vector<16x64xf32>
    %185 = arith.mulf %184, %181 : vector<16x64xf32>
    %186 = arith.mulf %185, %181 : vector<16x64xf32>
    %187 = arith.mulf %186, %181 : vector<16x64xf32>
    %188 = arith.addf %181, %187 : vector<16x64xf32>
    %cst_76 = arith.constant 0.797884583 : f32
    %189 = vector.broadcast %cst_76 : f32 to vector<16x64xf32>
    %190 = arith.mulf %189, %188 : vector<16x64xf32>
    %191 = math.tanh %190 : vector<16x64xf32>
    %cst_77 = arith.constant 1.000000e+00 : f32
    %192 = vector.broadcast %cst_77 : f32 to vector<16x64xf32>
    %193 = arith.addf %192, %191 : vector<16x64xf32>
    %194 = arith.mulf %183, %193 : vector<16x64xf32>
    %195 = arith.truncf %194 : vector<16x64xf32> to vector<16x64xbf16>
    %c0_78 = arith.constant 0 : index
    %c0_79 = arith.constant 0 : index
    %c0_80 = arith.constant 0 : index
    %196 = vector.load %arg13[%c0_78, %c0_79, %c0_80] : memref<2x64x32xbf16, #tpu.memory_space<vmem>>, vector<1x64x32xbf16>
    %197 = vector.shape_cast %196 : vector<1x64x32xbf16> to vector<64x32xbf16>
    %cst_81 = arith.constant dense<0.000000e+00> : vector<16x32xf32>
    %198 = tpu.matmul %195, %197, %cst_81 {dimension_numbers = #tpu.dot_dimension_numbers<[1], [0], [0], [1], [0, 0, 1, 1], [], []>} : vector<16x64xbf16>, vector<64x32xbf16>, vector<16x32xf32> -> vector<16x32xf32>
    %c0_82 = arith.constant 0 : index
    %c0_83 = arith.constant 0 : index
    %c0_84 = arith.constant 0 : index
    %199 = vector.load %arg14[%c0_82, %c0_83, %c0_84] : memref<2x1x32xf32, #tpu.memory_space<vmem>>, vector<1x1x32xf32>
    %200 = vector.shape_cast %199 : vector<1x1x32xf32> to vector<1x32xf32>
    %201 = vector.broadcast %200 : vector<1x32xf32> to vector<16x32xf32>
    %202 = arith.addf %198, %201 : vector<16x32xf32>
    %203 = arith.addf %202, %173 : vector<16x32xf32>
    %c0_85 = arith.constant 0 : index
    %c0_86 = arith.constant 0 : index
    %c0_87 = arith.constant 0 : index
    %204 = vector.load %arg15[%c0_85, %c0_86, %c0_87] : memref<2x1x32xf32, #tpu.memory_space<vmem>>, vector<1x1x32xf32>
    %205 = vector.shape_cast %204 : vector<1x1x32xf32> to vector<1x32xf32>
    %c0_88 = arith.constant 0 : index
    %c0_89 = arith.constant 0 : index
    %c0_90 = arith.constant 0 : index
    %206 = vector.load %arg16[%c0_88, %c0_89, %c0_90] : memref<2x1x32xf32, #tpu.memory_space<vmem>>, vector<1x1x32xf32>
    %207 = vector.shape_cast %206 : vector<1x1x32xf32> to vector<1x32xf32>
    %cst_91 = arith.constant dense<0.000000e+00> : vector<16xf32>
    %208 = vector.multi_reduction <add>, %203, %cst_91 [1] : vector<16x32xf32> to vector<16xf32>
    %209 = vector.shape_cast %208 : vector<16xf32> to vector<16x1xf32>
    %cst_92 = arith.constant 3.200000e+01 : f32
    %210 = vector.broadcast %cst_92 : f32 to vector<16x1xf32>
    %211 = arith.divf %209, %210 : vector<16x1xf32>
    %212 = vector.broadcast %211 : vector<16x1xf32> to vector<16x32xf32>
    %213 = arith.subf %203, %212 : vector<16x32xf32>
    %214 = arith.mulf %213, %213 : vector<16x32xf32>
    %cst_93 = arith.constant dense<0.000000e+00> : vector<16xf32>
    %215 = vector.multi_reduction <add>, %214, %cst_93 [1] : vector<16x32xf32> to vector<16xf32>
    %216 = vector.shape_cast %215 : vector<16xf32> to vector<16x1xf32>
    %cst_94 = arith.constant 3.200000e+01 : f32
    %217 = vector.broadcast %cst_94 : f32 to vector<16x1xf32>
    %218 = arith.divf %216, %217 : vector<16x1xf32>
    %cst_95 = arith.constant 9.99999996E-13 : f32
    %219 = vector.broadcast %cst_95 : f32 to vector<16x1xf32>
    %220 = arith.addf %218, %219 : vector<16x1xf32>
    %221 = math.rsqrt %220 : vector<16x1xf32>
    %222 = vector.broadcast %211 : vector<16x1xf32> to vector<16x32xf32>
    %223 = arith.subf %203, %222 : vector<16x32xf32>
    %224 = vector.broadcast %221 : vector<16x1xf32> to vector<16x32xf32>
    %225 = arith.mulf %223, %224 : vector<16x32xf32>
    %226 = vector.broadcast %205 : vector<1x32xf32> to vector<16x32xf32>
    %227 = arith.mulf %225, %226 : vector<16x32xf32>
    %228 = vector.broadcast %207 : vector<1x32xf32> to vector<16x32xf32>
    %229 = arith.addf %227, %228 : vector<16x32xf32>
    %230 = arith.truncf %229 : vector<16x32xf32> to vector<16x32xbf16>
    %c1 = arith.constant 1 : index
    %c0_96 = arith.constant 0 : index
    %c0_97 = arith.constant 0 : index
    %231 = vector.load %arg5[%c1, %c0_96, %c0_97] : memref<2x32x96xbf16, #tpu.memory_space<vmem>>, vector<1x32x96xbf16>
    %232 = vector.shape_cast %231 : vector<1x32x96xbf16> to vector<32x96xbf16>
    %cst_98 = arith.constant dense<0.000000e+00> : vector<16x96xf32>
    %233 = tpu.matmul %230, %232, %cst_98 {dimension_numbers = #tpu.dot_dimension_numbers<[1], [0], [0], [1], [0, 0, 1, 1], [], []>} : vector<16x32xbf16>, vector<32x96xbf16>, vector<16x96xf32> -> vector<16x96xf32>
    %c1_99 = arith.constant 1 : index
    %c0_100 = arith.constant 0 : index
    %c0_101 = arith.constant 0 : index
    %234 = vector.load %arg6[%c1_99, %c0_100, %c0_101] : memref<2x1x96xf32, #tpu.memory_space<vmem>>, vector<1x1x96xf32>
    %235 = vector.shape_cast %234 : vector<1x1x96xf32> to vector<1x96xf32>
    %236 = vector.broadcast %235 : vector<1x96xf32> to vector<16x96xf32>
    %237 = arith.addf %233, %236 : vector<16x96xf32>
    %238 = vector.extract_strided_slice %237 {offsets = [0, 0], sizes = [16, 32], strides = [1, 1]} : vector<16x96xf32> to vector<16x32xf32>
    %239 = vector.extract_strided_slice %237 {offsets = [0, 32], sizes = [16, 32], strides = [1, 1]} : vector<16x96xf32> to vector<16x32xf32>
    %240 = vector.extract_strided_slice %237 {offsets = [0, 64], sizes = [16, 32], strides = [1, 1]} : vector<16x96xf32> to vector<16x32xf32>
    %241 = vector.extract_strided_slice %238 {offsets = [0, 0], sizes = [8, 16], strides = [1, 1]} : vector<16x32xf32> to vector<8x16xf32>
    %242 = arith.truncf %241 : vector<8x16xf32> to vector<8x16xbf16>
    %243 = vector.extract_strided_slice %239 {offsets = [0, 0], sizes = [8, 16], strides = [1, 1]} : vector<16x32xf32> to vector<8x16xf32>
    %244 = arith.truncf %243 : vector<8x16xf32> to vector<8x16xbf16>
    %245 = vector.extract_strided_slice %240 {offsets = [0, 0], sizes = [8, 16], strides = [1, 1]} : vector<16x32xf32> to vector<8x16xf32>
    %246 = arith.truncf %245 : vector<8x16xf32> to vector<8x16xbf16>
    %247 = tpu.transpose %244, [1, 0] : vector<8x16xbf16> -> vector<16x8xbf16>
    %cst_102 = arith.constant dense<0.000000e+00> : vector<8x8xf32>
    %248 = tpu.matmul %242, %247, %cst_102 {dimension_numbers = #tpu.dot_dimension_numbers<[1], [0], [0], [1], [0, 0, 1, 1], [], []>} : vector<8x16xbf16>, vector<16x8xbf16>, vector<8x8xf32> -> vector<8x8xf32>
    %cst_103 = arith.constant 2.500000e-01 : f32
    %249 = vector.broadcast %cst_103 : f32 to vector<8x8xf32>
    %250 = arith.mulf %248, %249 : vector<8x8xf32>
    %cst_104 = arith.constant dense<0xFF800000> : vector<8xf32>
    %251 = vector.multi_reduction <maximumf>, %250, %cst_104 [1] : vector<8x8xf32> to vector<8xf32>
    %252 = vector.shape_cast %251 : vector<8xf32> to vector<8x1xf32>
    %253 = vector.broadcast %252 : vector<8x1xf32> to vector<8x8xf32>
    %254 = arith.subf %250, %253 : vector<8x8xf32>
    %255 = math.exp %254 : vector<8x8xf32>
    %cst_105 = arith.constant dense<0.000000e+00> : vector<8xf32>
    %256 = vector.multi_reduction <add>, %255, %cst_105 [1] : vector<8x8xf32> to vector<8xf32>
    %257 = vector.shape_cast %256 : vector<8xf32> to vector<8x1xf32>
    %258 = arith.truncf %255 : vector<8x8xf32> to vector<8x8xbf16>
    %cst_106 = arith.constant dense<0.000000e+00> : vector<8x16xf32>
    %259 = tpu.matmul %258, %246, %cst_106 {dimension_numbers = #tpu.dot_dimension_numbers<[1], [0], [0], [1], [0, 0, 1, 1], [], []>} : vector<8x8xbf16>, vector<8x16xbf16>, vector<8x16xf32> -> vector<8x16xf32>
    %260 = tpu.reciprocal %257 {approx = true} : vector<8x1xf32> -> vector<8x1xf32>
    %261 = vector.broadcast %260 : vector<8x1xf32> to vector<8x16xf32>
    %262 = arith.mulf %259, %261 : vector<8x16xf32>
    %c0_107 = arith.constant 0 : index
    %c0_108 = arith.constant 0 : index
    %263 = vector.load %arg22[%c0_107, %c0_108] : memref<16x32xf32, #tpu.memory_space<vmem>>, vector<8x16xf32>
    tpu.vector_store %arg22[%c0_107, %c0_108], %262 {strides = array<i32>} : memref<16x32xf32, #tpu.memory_space<vmem>>, vector<8x16xf32>,
    %264 = vector.extract_strided_slice %238 {offsets = [0, 16], sizes = [8, 16], strides = [1, 1]} : vector<16x32xf32> to vector<8x16xf32>
    %265 = arith.truncf %264 : vector<8x16xf32> to vector<8x16xbf16>
    %266 = vector.extract_strided_slice %239 {offsets = [0, 16], sizes = [8, 16], strides = [1, 1]} : vector<16x32xf32> to vector<8x16xf32>
    %267 = arith.truncf %266 : vector<8x16xf32> to vector<8x16xbf16>
    %268 = vector.extract_strided_slice %240 {offsets = [0, 16], sizes = [8, 16], strides = [1, 1]} : vector<16x32xf32> to vector<8x16xf32>
    %269 = arith.truncf %268 : vector<8x16xf32> to vector<8x16xbf16>
    %270 = tpu.transpose %267, [1, 0] : vector<8x16xbf16> -> vector<16x8xbf16>
    %cst_109 = arith.constant dense<0.000000e+00> : vector<8x8xf32>
    %271 = tpu.matmul %265, %270, %cst_109 {dimension_numbers = #tpu.dot_dimension_numbers<[1], [0], [0], [1], [0, 0, 1, 1], [], []>} : vector<8x16xbf16>, vector<16x8xbf16>, vector<8x8xf32> -> vector<8x8xf32>
    %cst_110 = arith.constant 2.500000e-01 : f32
    %272 = vector.broadcast %cst_110 : f32 to vector<8x8xf32>
    %273 = arith.mulf %271, %272 : vector<8x8xf32>
    %cst_111 = arith.constant dense<0xFF800000> : vector<8xf32>
    %274 = vector.multi_reduction <maximumf>, %273, %cst_111 [1] : vector<8x8xf32> to vector<8xf32>
    %275 = vector.shape_cast %274 : vector<8xf32> to vector<8x1xf32>
    %276 = vector.broadcast %275 : vector<8x1xf32> to vector<8x8xf32>
    %277 = arith.subf %273, %276 : vector<8x8xf32>
    %278 = math.exp %277 : vector<8x8xf32>
    %cst_112 = arith.constant dense<0.000000e+00> : vector<8xf32>
    %279 = vector.multi_reduction <add>, %278, %cst_112 [1] : vector<8x8xf32> to vector<8xf32>
    %280 = vector.shape_cast %279 : vector<8xf32> to vector<8x1xf32>
    %281 = arith.truncf %278 : vector<8x8xf32> to vector<8x8xbf16>
    %cst_113 = arith.constant dense<0.000000e+00> : vector<8x16xf32>
    %282 = tpu.matmul %281, %269, %cst_113 {dimension_numbers = #tpu.dot_dimension_numbers<[1], [0], [0], [1], [0, 0, 1, 1], [], []>} : vector<8x8xbf16>, vector<8x16xbf16>, vector<8x16xf32> -> vector<8x16xf32>
    %283 = tpu.reciprocal %280 {approx = true} : vector<8x1xf32> -> vector<8x1xf32>
    %284 = vector.broadcast %283 : vector<8x1xf32> to vector<8x16xf32>
    %285 = arith.mulf %282, %284 : vector<8x16xf32>
    %c0_114 = arith.constant 0 : index
    %c16_115 = arith.constant 16 : index
    %286 = vector.load %arg22[%c0_114, %c16_115] : memref<16x32xf32, #tpu.memory_space<vmem>>, vector<8x16xf32>
    tpu.vector_store %arg22[%c0_114, %c16_115], %285 {strides = array<i32>} : memref<16x32xf32, #tpu.memory_space<vmem>>, vector<8x16xf32>,
    %287 = vector.extract_strided_slice %238 {offsets = [8, 0], sizes = [8, 16], strides = [1, 1]} : vector<16x32xf32> to vector<8x16xf32>
    %288 = arith.truncf %287 : vector<8x16xf32> to vector<8x16xbf16>
    %289 = vector.extract_strided_slice %239 {offsets = [8, 0], sizes = [8, 16], strides = [1, 1]} : vector<16x32xf32> to vector<8x16xf32>
    %290 = arith.truncf %289 : vector<8x16xf32> to vector<8x16xbf16>
    %291 = vector.extract_strided_slice %240 {offsets = [8, 0], sizes = [8, 16], strides = [1, 1]} : vector<16x32xf32> to vector<8x16xf32>
    %292 = arith.truncf %291 : vector<8x16xf32> to vector<8x16xbf16>
    %293 = tpu.transpose %290, [1, 0] : vector<8x16xbf16> -> vector<16x8xbf16>
    %cst_116 = arith.constant dense<0.000000e+00> : vector<8x8xf32>
    %294 = tpu.matmul %288, %293, %cst_116 {dimension_numbers = #tpu.dot_dimension_numbers<[1], [0], [0], [1], [0, 0, 1, 1], [], []>} : vector<8x16xbf16>, vector<16x8xbf16>, vector<8x8xf32> -> vector<8x8xf32>
    %cst_117 = arith.constant 2.500000e-01 : f32
    %295 = vector.broadcast %cst_117 : f32 to vector<8x8xf32>
    %296 = arith.mulf %294, %295 : vector<8x8xf32>
    %cst_118 = arith.constant dense<0xFF800000> : vector<8xf32>
    %297 = vector.multi_reduction <maximumf>, %296, %cst_118 [1] : vector<8x8xf32> to vector<8xf32>
    %298 = vector.shape_cast %297 : vector<8xf32> to vector<8x1xf32>
    %299 = vector.broadcast %298 : vector<8x1xf32> to vector<8x8xf32>
    %300 = arith.subf %296, %299 : vector<8x8xf32>
    %301 = math.exp %300 : vector<8x8xf32>
    %cst_119 = arith.constant dense<0.000000e+00> : vector<8xf32>
    %302 = vector.multi_reduction <add>, %301, %cst_119 [1] : vector<8x8xf32> to vector<8xf32>
    %303 = vector.shape_cast %302 : vector<8xf32> to vector<8x1xf32>
    %304 = arith.truncf %301 : vector<8x8xf32> to vector<8x8xbf16>
    %cst_120 = arith.constant dense<0.000000e+00> : vector<8x16xf32>
    %305 = tpu.matmul %304, %292, %cst_120 {dimension_numbers = #tpu.dot_dimension_numbers<[1], [0], [0], [1], [0, 0, 1, 1], [], []>} : vector<8x8xbf16>, vector<8x16xbf16>, vector<8x16xf32> -> vector<8x16xf32>
    %306 = tpu.reciprocal %303 {approx = true} : vector<8x1xf32> -> vector<8x1xf32>
    %307 = vector.broadcast %306 : vector<8x1xf32> to vector<8x16xf32>
    %308 = arith.mulf %305, %307 : vector<8x16xf32>
    %c8_121 = arith.constant 8 : index
    %c0_122 = arith.constant 0 : index
    %309 = vector.load %arg22[%c8_121, %c0_122] : memref<16x32xf32, #tpu.memory_space<vmem>>, vector<8x16xf32>
    tpu.vector_store %arg22[%c8_121, %c0_122], %308 {strides = array<i32>} : memref<16x32xf32, #tpu.memory_space<vmem>>, vector<8x16xf32>,
    %310 = vector.extract_strided_slice %238 {offsets = [8, 16], sizes = [8, 16], strides = [1, 1]} : vector<16x32xf32> to vector<8x16xf32>
    %311 = arith.truncf %310 : vector<8x16xf32> to vector<8x16xbf16>
    %312 = vector.extract_strided_slice %239 {offsets = [8, 16], sizes = [8, 16], strides = [1, 1]} : vector<16x32xf32> to vector<8x16xf32>
    %313 = arith.truncf %312 : vector<8x16xf32> to vector<8x16xbf16>
    %314 = vector.extract_strided_slice %240 {offsets = [8, 16], sizes = [8, 16], strides = [1, 1]} : vector<16x32xf32> to vector<8x16xf32>
    %315 = arith.truncf %314 : vector<8x16xf32> to vector<8x16xbf16>
    %316 = tpu.transpose %313, [1, 0] : vector<8x16xbf16> -> vector<16x8xbf16>
    %cst_123 = arith.constant dense<0.000000e+00> : vector<8x8xf32>
    %317 = tpu.matmul %311, %316, %cst_123 {dimension_numbers = #tpu.dot_dimension_numbers<[1], [0], [0], [1], [0, 0, 1, 1], [], []>} : vector<8x16xbf16>, vector<16x8xbf16>, vector<8x8xf32> -> vector<8x8xf32>
    %cst_124 = arith.constant 2.500000e-01 : f32
    %318 = vector.broadcast %cst_124 : f32 to vector<8x8xf32>
    %319 = arith.mulf %317, %318 : vector<8x8xf32>
    %cst_125 = arith.constant dense<0xFF800000> : vector<8xf32>
    %320 = vector.multi_reduction <maximumf>, %319, %cst_125 [1] : vector<8x8xf32> to vector<8xf32>
    %321 = vector.shape_cast %320 : vector<8xf32> to vector<8x1xf32>
    %322 = vector.broadcast %321 : vector<8x1xf32> to vector<8x8xf32>
    %323 = arith.subf %319, %322 : vector<8x8xf32>
    %324 = math.exp %323 : vector<8x8xf32>
    %cst_126 = arith.constant dense<0.000000e+00> : vector<8xf32>
    %325 = vector.multi_reduction <add>, %324, %cst_126 [1] : vector<8x8xf32> to vector<8xf32>
    %326 = vector.shape_cast %325 : vector<8xf32> to vector<8x1xf32>
    %327 = arith.truncf %324 : vector<8x8xf32> to vector<8x8xbf16>
    %cst_127 = arith.constant dense<0.000000e+00> : vector<8x16xf32>
    %328 = tpu.matmul %327, %315, %cst_127 {dimension_numbers = #tpu.dot_dimension_numbers<[1], [0], [0], [1], [0, 0, 1, 1], [], []>} : vector<8x8xbf16>, vector<8x16xbf16>, vector<8x16xf32> -> vector<8x16xf32>
    %329 = tpu.reciprocal %326 {approx = true} : vector<8x1xf32> -> vector<8x1xf32>
    %330 = vector.broadcast %329 : vector<8x1xf32> to vector<8x16xf32>
    %331 = arith.mulf %328, %330 : vector<8x16xf32>
    %c8_128 = arith.constant 8 : index
    %c16_129 = arith.constant 16 : index
    %332 = vector.load %arg22[%c8_128, %c16_129] : memref<16x32xf32, #tpu.memory_space<vmem>>, vector<8x16xf32>
    tpu.vector_store %arg22[%c8_128, %c16_129], %331 {strides = array<i32>} : memref<16x32xf32, #tpu.memory_space<vmem>>, vector<8x16xf32>,
    %c0_130 = arith.constant 0 : index
    %c0_131 = arith.constant 0 : index
    %333 = vector.load %arg22[%c0_130, %c0_131] : memref<16x32xf32, #tpu.memory_space<vmem>>, vector<16x32xf32>
    %334 = arith.truncf %333 : vector<16x32xf32> to vector<16x32xbf16>
    %c1_132 = arith.constant 1 : index
    %c0_133 = arith.constant 0 : index
    %c0_134 = arith.constant 0 : index
    %335 = vector.load %arg7[%c1_132, %c0_133, %c0_134] : memref<2x32x32xbf16, #tpu.memory_space<vmem>>, vector<1x32x32xbf16>
    %336 = vector.shape_cast %335 : vector<1x32x32xbf16> to vector<32x32xbf16>
    %cst_135 = arith.constant dense<0.000000e+00> : vector<16x32xf32>
    %337 = tpu.matmul %334, %336, %cst_135 {dimension_numbers = #tpu.dot_dimension_numbers<[1], [0], [0], [1], [0, 0, 1, 1], [], []>} : vector<16x32xbf16>, vector<32x32xbf16>, vector<16x32xf32> -> vector<16x32xf32>
    %c1_136 = arith.constant 1 : index
    %c0_137 = arith.constant 0 : index
    %c0_138 = arith.constant 0 : index
    %338 = vector.load %arg8[%c1_136, %c0_137, %c0_138] : memref<2x1x32xf32, #tpu.memory_space<vmem>>, vector<1x1x32xf32>
    %339 = vector.shape_cast %338 : vector<1x1x32xf32> to vector<1x32xf32>
    %340 = vector.broadcast %339 : vector<1x32xf32> to vector<16x32xf32>
    %341 = arith.addf %337, %340 : vector<16x32xf32>
    %342 = arith.addf %341, %229 : vector<16x32xf32>
    %c1_139 = arith.constant 1 : index
    %c0_140 = arith.constant 0 : index
    %c0_141 = arith.constant 0 : index
    %343 = vector.load %arg9[%c1_139, %c0_140, %c0_141] : memref<2x1x32xf32, #tpu.memory_space<vmem>>, vector<1x1x32xf32>
    %344 = vector.shape_cast %343 : vector<1x1x32xf32> to vector<1x32xf32>
    %c1_142 = arith.constant 1 : index
    %c0_143 = arith.constant 0 : index
    %c0_144 = arith.constant 0 : index
    %345 = vector.load %arg10[%c1_142, %c0_143, %c0_144] : memref<2x1x32xf32, #tpu.memory_space<vmem>>, vector<1x1x32xf32>
    %346 = vector.shape_cast %345 : vector<1x1x32xf32> to vector<1x32xf32>
    %cst_145 = arith.constant dense<0.000000e+00> : vector<16xf32>
    %347 = vector.multi_reduction <add>, %342, %cst_145 [1] : vector<16x32xf32> to vector<16xf32>
    %348 = vector.shape_cast %347 : vector<16xf32> to vector<16x1xf32>
    %cst_146 = arith.constant 3.200000e+01 : f32
    %349 = vector.broadcast %cst_146 : f32 to vector<16x1xf32>
    %350 = arith.divf %348, %349 : vector<16x1xf32>
    %351 = vector.broadcast %350 : vector<16x1xf32> to vector<16x32xf32>
    %352 = arith.subf %342, %351 : vector<16x32xf32>
    %353 = arith.mulf %352, %352 : vector<16x32xf32>
    %cst_147 = arith.constant dense<0.000000e+00> : vector<16xf32>
    %354 = vector.multi_reduction <add>, %353, %cst_147 [1] : vector<16x32xf32> to vector<16xf32>
    %355 = vector.shape_cast %354 : vector<16xf32> to vector<16x1xf32>
    %cst_148 = arith.constant 3.200000e+01 : f32
    %356 = vector.broadcast %cst_148 : f32 to vector<16x1xf32>
    %357 = arith.divf %355, %356 : vector<16x1xf32>
    %cst_149 = arith.constant 9.99999996E-13 : f32
    %358 = vector.broadcast %cst_149 : f32 to vector<16x1xf32>
    %359 = arith.addf %357, %358 : vector<16x1xf32>
    %360 = math.rsqrt %359 : vector<16x1xf32>
    %361 = vector.broadcast %350 : vector<16x1xf32> to vector<16x32xf32>
    %362 = arith.subf %342, %361 : vector<16x32xf32>
    %363 = vector.broadcast %360 : vector<16x1xf32> to vector<16x32xf32>
    %364 = arith.mulf %362, %363 : vector<16x32xf32>
    %365 = vector.broadcast %344 : vector<1x32xf32> to vector<16x32xf32>
    %366 = arith.mulf %364, %365 : vector<16x32xf32>
    %367 = vector.broadcast %346 : vector<1x32xf32> to vector<16x32xf32>
    %368 = arith.addf %366, %367 : vector<16x32xf32>
    %369 = arith.truncf %368 : vector<16x32xf32> to vector<16x32xbf16>
    %c1_150 = arith.constant 1 : index
    %c0_151 = arith.constant 0 : index
    %c0_152 = arith.constant 0 : index
    %370 = vector.load %arg11[%c1_150, %c0_151, %c0_152] : memref<2x32x64xbf16, #tpu.memory_space<vmem>>, vector<1x32x64xbf16>
    %371 = vector.shape_cast %370 : vector<1x32x64xbf16> to vector<32x64xbf16>
    %cst_153 = arith.constant dense<0.000000e+00> : vector<16x64xf32>
    %372 = tpu.matmul %369, %371, %cst_153 {dimension_numbers = #tpu.dot_dimension_numbers<[1], [0], [0], [1], [0, 0, 1, 1], [], []>} : vector<16x32xbf16>, vector<32x64xbf16>, vector<16x64xf32> -> vector<16x64xf32>
    %c1_154 = arith.constant 1 : index
    %c0_155 = arith.constant 0 : index
    %c0_156 = arith.constant 0 : index
    %373 = vector.load %arg12[%c1_154, %c0_155, %c0_156] : memref<2x1x64xf32, #tpu.memory_space<vmem>>, vector<1x1x64xf32>
    %374 = vector.shape_cast %373 : vector<1x1x64xf32> to vector<1x64xf32>
    %375 = vector.broadcast %374 : vector<1x64xf32> to vector<16x64xf32>
    %376 = arith.addf %372, %375 : vector<16x64xf32>
    %cst_157 = arith.constant 5.000000e-01 : f32
    %377 = vector.broadcast %cst_157 : f32 to vector<16x64xf32>
    %378 = arith.mulf %377, %376 : vector<16x64xf32>
    %cst_158 = arith.constant 4.471500e-02 : f32
    %379 = vector.broadcast %cst_158 : f32 to vector<16x64xf32>
    %380 = arith.mulf %379, %376 : vector<16x64xf32>
    %381 = arith.mulf %380, %376 : vector<16x64xf32>
    %382 = arith.mulf %381, %376 : vector<16x64xf32>
    %383 = arith.addf %376, %382 : vector<16x64xf32>
    %cst_159 = arith.constant 0.797884583 : f32
    %384 = vector.broadcast %cst_159 : f32 to vector<16x64xf32>
    %385 = arith.mulf %384, %383 : vector<16x64xf32>
    %386 = math.tanh %385 : vector<16x64xf32>
    %cst_160 = arith.constant 1.000000e+00 : f32
    %387 = vector.broadcast %cst_160 : f32 to vector<16x64xf32>
    %388 = arith.addf %387, %386 : vector<16x64xf32>
    %389 = arith.mulf %378, %388 : vector<16x64xf32>
    %390 = arith.truncf %389 : vector<16x64xf32> to vector<16x64xbf16>
    %c1_161 = arith.constant 1 : index
    %c0_162 = arith.constant 0 : index
    %c0_163 = arith.constant 0 : index
    %391 = vector.load %arg13[%c1_161, %c0_162, %c0_163] : memref<2x64x32xbf16, #tpu.memory_space<vmem>>, vector<1x64x32xbf16>
    %392 = vector.shape_cast %391 : vector<1x64x32xbf16> to vector<64x32xbf16>
    %cst_164 = arith.constant dense<0.000000e+00> : vector<16x32xf32>
    %393 = tpu.matmul %390, %392, %cst_164 {dimension_numbers = #tpu.dot_dimension_numbers<[1], [0], [0], [1], [0, 0, 1, 1], [], []>} : vector<16x64xbf16>, vector<64x32xbf16>, vector<16x32xf32> -> vector<16x32xf32>
    %c1_165 = arith.constant 1 : index
    %c0_166 = arith.constant 0 : index
    %c0_167 = arith.constant 0 : index
    %394 = vector.load %arg14[%c1_165, %c0_166, %c0_167] : memref<2x1x32xf32, #tpu.memory_space<vmem>>, vector<1x1x32xf32>
    %395 = vector.shape_cast %394 : vector<1x1x32xf32> to vector<1x32xf32>
    %396 = vector.broadcast %395 : vector<1x32xf32> to vector<16x32xf32>
    %397 = arith.addf %393, %396 : vector<16x32xf32>
    %398 = arith.addf %397, %368 : vector<16x32xf32>
    %c1_168 = arith.constant 1 : index
    %c0_169 = arith.constant 0 : index
    %c0_170 = arith.constant 0 : index
    %399 = vector.load %arg15[%c1_168, %c0_169, %c0_170] : memref<2x1x32xf32, #tpu.memory_space<vmem>>, vector<1x1x32xf32>
    %400 = vector.shape_cast %399 : vector<1x1x32xf32> to vector<1x32xf32>
    %c1_171 = arith.constant 1 : index
    %c0_172 = arith.constant 0 : index
    %c0_173 = arith.constant 0 : index
    %401 = vector.load %arg16[%c1_171, %c0_172, %c0_173] : memref<2x1x32xf32, #tpu.memory_space<vmem>>, vector<1x1x32xf32>
    %402 = vector.shape_cast %401 : vector<1x1x32xf32> to vector<1x32xf32>
    %cst_174 = arith.constant dense<0.000000e+00> : vector<16xf32>
    %403 = vector.multi_reduction <add>, %398, %cst_174 [1] : vector<16x32xf32> to vector<16xf32>
    %404 = vector.shape_cast %403 : vector<16xf32> to vector<16x1xf32>
    %cst_175 = arith.constant 3.200000e+01 : f32
    %405 = vector.broadcast %cst_175 : f32 to vector<16x1xf32>
    %406 = arith.divf %404, %405 : vector<16x1xf32>
    %407 = vector.broadcast %406 : vector<16x1xf32> to vector<16x32xf32>
    %408 = arith.subf %398, %407 : vector<16x32xf32>
    %409 = arith.mulf %408, %408 : vector<16x32xf32>
    %cst_176 = arith.constant dense<0.000000e+00> : vector<16xf32>
    %410 = vector.multi_reduction <add>, %409, %cst_176 [1] : vector<16x32xf32> to vector<16xf32>
    %411 = vector.shape_cast %410 : vector<16xf32> to vector<16x1xf32>
    %cst_177 = arith.constant 3.200000e+01 : f32
    %412 = vector.broadcast %cst_177 : f32 to vector<16x1xf32>
    %413 = arith.divf %411, %412 : vector<16x1xf32>
    %cst_178 = arith.constant 9.99999996E-13 : f32
    %414 = vector.broadcast %cst_178 : f32 to vector<16x1xf32>
    %415 = arith.addf %413, %414 : vector<16x1xf32>
    %416 = math.rsqrt %415 : vector<16x1xf32>
    %417 = vector.broadcast %406 : vector<16x1xf32> to vector<16x32xf32>
    %418 = arith.subf %398, %417 : vector<16x32xf32>
    %419 = vector.broadcast %416 : vector<16x1xf32> to vector<16x32xf32>
    %420 = arith.mulf %418, %419 : vector<16x32xf32>
    %421 = vector.broadcast %400 : vector<1x32xf32> to vector<16x32xf32>
    %422 = arith.mulf %420, %421 : vector<16x32xf32>
    %423 = vector.broadcast %402 : vector<1x32xf32> to vector<16x32xf32>
    %424 = arith.addf %422, %423 : vector<16x32xf32>
    %425 = vector.extract_strided_slice %424 {offsets = [0, 0], sizes = [1, 32], strides = [1, 1]} : vector<16x32xf32> to vector<1x32xf32>
    %426 = vector.extract_strided_slice %424 {offsets = [8, 0], sizes = [1, 32], strides = [1, 1]} : vector<16x32xf32> to vector<1x32xf32>
    %427 = tpu.concatenate %425, %426 in 0 : vector<1x32xf32>, vector<1x32xf32> -> vector<2x32xf32>
    %428 = arith.truncf %427 : vector<2x32xf32> to vector<2x32xbf16>
    %c0_179 = arith.constant 0 : index
    %c0_180 = arith.constant 0 : index
    %429 = vector.load %arg17[%c0_179, %c0_180] : memref<32x32xbf16, #tpu.memory_space<vmem>>, vector<32x32xbf16>
    %cst_181 = arith.constant dense<0.000000e+00> : vector<2x32xf32>
    %430 = tpu.matmul %428, %429, %cst_181 {dimension_numbers = #tpu.dot_dimension_numbers<[1], [0], [0], [1], [0, 0, 1, 1], [], []>} : vector<2x32xbf16>, vector<32x32xbf16>, vector<2x32xf32> -> vector<2x32xf32>
    %c0_182 = arith.constant 0 : index
    %c0_183 = arith.constant 0 : index
    %431 = vector.load %arg18[%c0_182, %c0_183] : memref<1x32xf32, #tpu.memory_space<vmem>>, vector<1x32xf32>
    %432 = vector.broadcast %431 : vector<1x32xf32> to vector<2x32xf32>
    %433 = arith.addf %430, %432 : vector<2x32xf32>
    %434 = math.tanh %433 : vector<2x32xf32>
    %435 = arith.truncf %434 : vector<2x32xf32> to vector<2x32xbf16>
    %c0_184 = arith.constant 0 : index
    %c0_185 = arith.constant 0 : index
    %436 = vector.load %arg19[%c0_184, %c0_185] : memref<32x16xbf16, #tpu.memory_space<vmem>>, vector<32x16xbf16>
    %cst_186 = arith.constant dense<0.000000e+00> : vector<2x16xf32>
    %437 = tpu.matmul %435, %436, %cst_186 {dimension_numbers = #tpu.dot_dimension_numbers<[1], [0], [0], [1], [0, 0, 1, 1], [], []>} : vector<2x32xbf16>, vector<32x16xbf16>, vector<2x16xf32> -> vector<2x16xf32>
    %c0_187 = arith.constant 0 : index
    %c0_188 = arith.constant 0 : index
    %438 = vector.load %arg20[%c0_187, %c0_188] : memref<1x16xf32, #tpu.memory_space<vmem>>, vector<1x16xf32>
    %439 = vector.broadcast %438 : vector<1x16xf32> to vector<2x16xf32>
    %440 = arith.addf %437, %439 : vector<2x16xf32>
    %c0_189 = arith.constant 0 : index
    %c0_190 = arith.constant 0 : index
    %441 = vector.load %arg21[%c0_189, %c0_190] : memref<2x16xf32, #tpu.memory_space<vmem>>, vector<2x16xf32>
    tpu.vector_store %arg21[%c0_189, %c0_190], %440 {strides = array<i32>} : memref<2x16xf32, #tpu.memory_space<vmem>>, vector<2x16xf32>,
    return
  }
}

</mosaic_0001>

<bundles_post_ra>
// kernel: bert_forward.1
= control target key start
LH: loop header
LB: loop body
LE: loop exit
PB: predicated region body
PF: predicated region fallthrough
CT: control target
= control target key end

     0   :  { %s3197_s0 = inlined_call_operand.vmem [shape: s32[16,1], index: 0, kind: input, shape index: {}]   ;;  %s3198_s1 = inlined_call_operand.vmem [shape: bf16[128,32], index: 1, kind: input, shape index: {}]   ;;  %s3199_s2 = inlined_call_operand.vmem [shape: f32[16,32], index: 2, kind: input, shape index: {}]   ;;  %s3200_s3 = inlined_call_operand.vmem [shape: f32[1,32], index: 3, kind: input, shape index: {}]   ;;  %s3201_s4 = inlined_call_operand.vmem [shape: f32[1,32], index: 4, kind: input, shape index: {}]   ;;  %s3202_s5 = inlined_call_operand.vmem [shape: bf16[2,32,96], index: 5, kind: input, shape index: {}]   ;;  %s3203_s6 = inlined_call_operand.vmem [shape: f32[2,1,96], index: 6, kind: input, shape index: {}]   ;;  %s3204_s7 = inlined_call_operand.vmem [shape: bf16[2,32,32], index: 7, kind: input, shape index: {}]   ;;  %s3205_s8 = inlined_call_operand.vmem [shape: f32[2,1,32], index: 8, kind: input, shape index: {}]   ;;  %s3206_s9 = inlined_call_operand.vmem [shape: f32[2,1,32], index: 9, kind: input, shape index: {}]   ;;  %s3207_s10 = inlined_call_operand.vmem [shape: f32[2,1,32], index: 10, kind: input, shape index: {}]   ;;  %s3208_s11 = inlined_call_operand.vmem [shape: bf16[2,32,64], index: 11, kind: input, shape index: {}]   ;;  %s3209_s12 = inlined_call_operand.vmem [shape: f32[2,1,64], index: 12, kind: input, shape index: {}]   ;;  %s3210_s13 = inlined_call_operand.vmem [shape: bf16[2,64,32], index: 13, kind: input, shape index: {}]   ;;  %s3211_s14 = inlined_call_operand.vmem [shape: f32[2,1,32], index: 14, kind: input, shape index: {}]   ;;  %s3212_s15 = inlined_call_operand.vmem [shape: f32[2,1,32], index: 15, kind: input, shape index: {}]   ;;  %s3213_s16 = inlined_call_operand.vmem [shape: f32[2,1,32], index: 16, kind: input, shape index: {}]   ;;  %s3214_s17 = inlined_call_operand.vmem [shape: bf16[32,32], index: 17, kind: input, shape index: {}]   ;;  %s3215_s18 = inlined_call_operand.vmem [shape: f32[1,32], index: 18, kind: input, shape index: {}]   ;;  %s3216_s19 = inlined_call_operand.vmem [shape: bf16[32,16], index: 19, kind: input, shape index: {}]   ;;  %s3217_s20 = inlined_call_operand.vmem [shape: f32[1,16], index: 20, kind: input, shape index: {}]   ;;  %s3218_s21 = inlined_call_operand.hbm [shape: f32[2,16], index: 21, kind: output, shape index: {}]  }
   0x1   :  { %3223 = sst [smem:[#allocation6_spill]] %s3197_s0 }
   0x2   :  { %3224 = sst [smem:[#allocation7_spill]] %s3198_s1 }
   0x3   :  { %3225 = sst [smem:[#allocation8_spill]] %s3199_s2 }
   0x4   :  { %3226 = sst [smem:[#allocation9_spill]] %s3200_s3 }
   0x5   :  { %3227 = sst [smem:[#allocation10_spill]] %s3201_s4 }
   0x6   :  { %3228 = sst [smem:[#allocation11_spill]] %s3202_s5 }
   0x7   :  { %s3229_s26 = sld [smem:[#allocation6_spill]]  ;;  %v2644_v1 = vmov 0   ;;  %v2645_v2 = vmov 0.0   ;;  %s3230_s28 = sld [smem:[#allocation7_spill]]  ;;  %vm2646_vm0 = vmmov 0  }
   0x8   :  { %2525 = vset.pattern.permute.xlu0 %v2644_v1  ;;  %2310 = vmatprep.subr.bf16.mxu0 %v2645_v2 }
   0x9   :  { %2330 = vmatprep.subr.bf16.mxu1 %v2645_v2  ;;  %2326 = vmatprep.mubr.msk.bf16.mxu0 %vm2646_vm0, %v2645_v2 }
   0xa   :  { %2334 = vmatprep.mubr.msk.bf16.mxu1 %vm2646_vm0, %v2645_v2 }
   0xd   :  { %v70_v0 = vld [vmem:[%s3229_s26] sm:$0xff]  ;;  %v71_v4 = vld [vmem:[%s3229_s26 + $0x8] sm:$0xff]  ;;  %v2528_v6 = vld [vmem:[%s3230_s28 + $0x10] sm:$0xff]  }
   0xe   :  { %v2526_v3 = vld [vmem:[%s3230_s28] sm:$0xff]   ;;  %75 = vperm.xlu0 %2525, %v70_v0   ;;  %v2527_v5 = vld [vmem:[%s3230_s28 + $0x8] sm:$0xff]   ;;  %v2529_v7 = vld [vmem:[%s3230_s28 + $0x18] sm:$0xff]  }
   0xf   :  { %2311 = vmatpush3.bf16.msra.mxu0 %v2526_v3  ;;  %v2530_v8 = vld [vmem:[%s3230_s28 + $0x20] sm:$0xff]   ;;  %v2531_v9 = vld [vmem:[%s3230_s28 + $0x28] sm:$0xff]   ;;  %v2532_v10 = vld [vmem:[%s3230_s28 + $0x30] sm:$0xff]  }
  0x10   :  { %2312 = vmatprep.subr.bf16.mxu0 %v2645_v2 }
  0x12   :  { %78 = vperm.xlu0 %2525, %v71_v4  }
  0x13   :  { %2313 = vmatpush3.bf16.msra.mxu0 %v2527_v5 }
  0x14   :  { %2314 = vmatprep.subr.bf16.mxu0 %v2645_v2 }
  0x17   :  { %2315 = vmatpush3.bf16.msra.mxu0 %v2528_v6 }
  0x18   :  { %2316 = vmatprep.subr.bf16.mxu0 %v2645_v2 }
  0x1b   :  { %2317 = vmatpush3.bf16.msra.mxu0 %v2529_v7 }
  0x1c   :  { %2318 = vmatprep.subr.bf16.mxu0 %v2645_v2 }
  0x1f   :  { %2319 = vmatpush3.bf16.msra.mxu0 %v2530_v8 }
  0x20   :  { %2320 = vmatprep.subr.bf16.mxu0 %v2645_v2 }
  0x23   :  { %2321 = vmatpush3.bf16.msra.mxu0 %v2531_v9 }
  0x24   :  { %2322 = vmatprep.subr.bf16.mxu0 %v2645_v2 }
  0x25   :  { %26 = vsyncpa [#allocation4], 0  ;;  %v2533_v11 = vld [vmem:[%s3230_s28 + $0x38] sm:$0xff]   ;;  %v72_v12 = vlaneseq  ;;  %v2647_v16 = vmov 1.0|1.0   ;;  %s3231_s28 = sld [smem:[#allocation8_spill]] }
  0x26   :  { %vm196_vm4 = vcmask 261120   ;;  %s3232_s24 = sld [smem:[#allocation11_spill]]  ;;  %s3233_s3 = sld [smem:[#allocation9_spill]]  ;;  %v2139_v56 = vld [vmem:[%s3203_s6] ss:$0 sm:$0xff]  ;;  %vm312_vm5 = vcmask 130048  }
  0x27   :  { %2323 = vmatpush3.bf16.msra.mxu0 %v2532_v10  ;;  %v73_v14 = vand.u32 127, %v72_v12  ;;  %s3234_s4 = sld [smem:[#allocation10_spill]]  ;;  %s2648_s5 = smov 64   ;;  %vm376_vm6 = vcmask 1043456   ;;  %vm360_vm7 = vcmask 64512   ;;  %vm538_vm8 = vcmask 261248  }
  0x28   :  { %2324 = vmatprep.subr.bf16.mxu0 %v2645_v2  ;;  %s2649_s22 = smov 96   ;;  %s2650_s23 = smov 80   ;;  %vm1010_vm9 = vcmask 523264   ;;  %vm1972_vm10 = vcmask 1040384   ;;  %vm2109_vm11 = vcmask 123904  }
  0x29   :  { %s2651_s1 = smov 112   ;;  %s2652_s2 = smov 48  }
  0x2a   :  { %s2653_s25 = smov 16  }
  0x2b   :  { %2325 = vmatpush3.bf16.msra.mxu0 %v2533_v11  ;;  %v103_v17 = vld [vmem:[%s3231_s28] sm:$0xff]  ;;  %v104_v19 = vld [vmem:[%s3231_s28 + $0x8] sm:$0xff] }
  0x2c   :  { %2356 = vmatprep.subr.bf16.mxu0 %v2645_v2  ;;  %v2534_v37 = vld [vmem:[%s3232_s24] sm:$0xff]   ;;  %v2535_v38 = vld [vmem:[%s3232_s24 + $0x8] sm:$0xff]  }
  0x2d   :  { %2331 = vmatpush3.bf16.msra.mxu1 %v2534_v37  ;;  %v2137_v47 = vld [vmem:[%s3233_s3] ss:$0 sm:$0xff] }
  0x2e   :  { %2332 = vmatprep.subr.bf16.mxu1 %v2645_v2  ;;  %v2138_v51 = vld [vmem:[%s3234_s4] ss:$0 sm:$0xff] }
  0x31   :  { %2333 = vmatpush3.bf16.msra.mxu1 %v2535_v38 }
  0x32   :  { %2338 = vmatprep.subr.bf16.mxu1 %v2645_v2 }
  0x8d   :  { %v76_v13 = vpop.permute.xlu0 %75 }
  0x8e   :  { %vm80_vm1 = vcmp.eq.s32.totalorder %v76_v13, %v73_v14 }
  0x91   :  { %v79_v15 = vpop.permute.xlu0 %78 }
  0x92   :  { %vm81_vm2 = vcmp.eq.s32.totalorder %v79_v15, %v73_v14 }
  0x93   :  { %vm2135_vm3 = vmpackc.low %vm81_vm2, %vm80_vm1 }
  0x94   :  { %2327 = vmatmul.mubr.msk.bf16.vlgmr.msra.gmra.mrb[0].mxu0 %vm2135_vm3, %v2647_v16 }
  0x95   :  { %2358 = vmatprep.mubr.msk.bf16.mxu0 %vm2646_vm0, %v2645_v2 }
 0x167   :  { %v187_v18 = vpop.f32.mrb[0].mxu0 }
 0x168   :  { %v188_v20 = vadd.f32 %v187_v18, %v103_v17  ;;  %v2328_v21 = vpop.f32.mrb[1].mxu0 }
 0x169   :  { %v190_v22 = vpop.f32.mrb[2].mxu0 }
 0x16a   :  { %v191_v23 = vadd.f32 %v190_v22, %v104_v19  ;;  %v2329_v24 = vpop.f32.mrb[3].mxu0  ;;  %v197_v25 = vsel %vm196_vm4, %v188_v20, 0.0 }
 0x16b   :  { %198 = vadd.xlane.f32.xlu1 %v197_v25 }
 0x16c   :  { %v200_v26 = vsel %vm196_vm4, %v191_v23, 0.0 }
 0x16f   :  { %201 = vadd.xlane.f32.xlu1 %v200_v26 }
 0x1f8   :  { %v199_v27 = vpop.xlane.xlu1 %198 }
 0x1f9   :  { %v204_v28 = vmul.f32 0.03125, %v199_v27 }
 0x1fb   :  { %v206_v29 = vsub.f32 %v188_v20, %v204_v28 }
 0x1fc   :  { %v202_v30 = vpop.xlane.xlu1 %201 }
 0x1fd   :  { %v205_v31 = vmul.f32 0.03125, %v202_v30  ;;  %v208_v32 = vmul.f32 %v206_v29, %v206_v29 }
 0x1ff   :  { %v207_v33 = vsub.f32 %v191_v23, %v205_v31  ;;  %v210_v34 = vsel %vm196_vm4, %v208_v32, 0.0 }
 0x200   :  { %211 = vadd.xlane.f32.xlu0 %v210_v34 }
 0x201   :  { %v209_v35 = vmul.f32 %v207_v33, %v207_v33 }
 0x203   :  { %v213_v36 = vsel %vm196_vm4, %v209_v35, 0.0 }
 0x204   :  { %214 = vadd.xlane.f32.xlu1 %v213_v36 }
 0x28d   :  { %v212_v39 = vpop.xlane.xlu0 %211 }
 0x28e   :  { %v216_v40 = vmul.f32 0.03125, %v212_v39 }
 0x290   :  { %v218_v41 = vadd.f32 1e-12, %v216_v40 }
 0x291   :  { %v215_v42 = vpop.xlane.xlu1 %214 }
 0x292   :  { %2558 = vrsqrt.f32 %v218_v41  ;;  %v217_v43 = vmul.f32 0.03125, %v215_v42 }
 0x294   :  { %v219_v44 = vadd.f32 1e-12, %v217_v43 }
 0x296   :  { %2560 = vrsqrt.f32 %v219_v44 }
 0x29c   :  { %v2559_v45 = vpop.eup %2558 }
 0x29d   :  { %v222_v46 = vmul.f32 %v2559_v45, %v206_v29 }
 0x29f   :  { %v230_v50 = vmul.f32 %v2137_v47, %v222_v46 }
 0x2a0   :  { %v2561_v48 = vpop.eup %2560 }
 0x2a1   :  { %v223_v49 = vmul.f32 %v2561_v48, %v207_v33  ;;  %v2835_v53 = vadd.f32 %v2138_v51, %v230_v50 }
 0x2a3   :  { %v231_v52 = vmul.f32 %v2137_v47, %v223_v49 }
 0x2a5   :  { %v2837_v54 = vadd.f32 %v2138_v51, %v231_v52 }
 0x2a7   :  { %v240_v55 = vpack.c.bf16 %v2837_v54, %v2835_v53 }
 0x2a9   :  { %2335 = vmatmul.mubr.msk.bf16.vlgmr.msra.gmra.mrb[0].mxu1 %vm196_vm4, %v240_v55 }
 0x2aa   :  { %2340 = vmatprep.mubr.msk.bf16.mxu1 %vm2646_vm0, %v2645_v2 }
 0x37c   :  { %v301_v57 = vpop.f32.mrb[0].mxu1 }
 0x37d   :  { %v302_v58 = vadd.f32 %v2139_v56, %v301_v57  ;;  %v2336_v59 = vpop.f32.mrb[1].mxu1 }
 0x37e   :  { %v304_v60 = vpop.f32.mrb[2].mxu1 }
 0x37f   :  { %v2847_v61 = vpack.c.bf16 %v302_v58, %v302_v58  ;;  %v2337_v62 = vpop.f32.mrb[3].mxu1  ;;  %v305_v63 = vadd.f32 %v2139_v56, %v304_v60 }
 0x381   :  { %371 = vrot.lane.b32.xlu0 %v2847_v61, %s2648_s5  ;;  %310 = vrot.lane.b32.xlu1 %v2847_v61, %s2649_s22  ;;  %v2857_v0 = vpack.c.bf16 %v305_v63, %v305_v63 }
 0x385   :  { %425 = vrot.lane.b32.xlu0 %v2847_v61, %s2650_s23 }
 0x389   :  { %423 = vrot.lane.b32.xlu0 %v2847_v61, %s2651_s1 }
 0x38d   :  { %654 = vrot.lane.b32.xlu0 %v2857_v0, %s2650_s23 }
 0x391   :  { %652 = vrot.lane.b32.xlu0 %v2857_v0, %s2651_s1 }
 0x3f3   :  { %v311_v1 = vpop.permute.xlu1 %310  ;;  %v372_v4 = vpop.permute.xlu0 %371 }
 0x3f4   :  { %v317_v3 = vsel %vm312_vm5, %v311_v1, 0  ;;  %v378_v5 = vsel %vm376_vm6, %v372_v4, 0 }
 0x3f5   :  { %2339 = vmatpush3.bf16.xpose.msra.mxu1 %v317_v3 }
 0x3f6   :  { %2344 = vmatprep.subr.bf16.mxu1 %v2645_v2 }
 0x3f7   :  { %v426_v16 = vpop.permute.xlu0 %425 }
 0x3f8   :  { %v431_v18 = vsel %vm312_vm5, %v426_v16, 0 }
 0x3fb   :  { %v424_v20 = vpop.permute.xlu0 %423 }
 0x3fc   :  { %2341 = vmatmul.mubr.msk.bf16.vlgmr.msra.gmra.mrb[4].mxu1 %vm312_vm5, %v2847_v61 }
 0x3fd   :  { %2345 = vmatpush3.bf16.msra.mxu1 %v378_v5  ;;  %2346 = vmatprep.mubr.msk.bf16.mxu1 %vm2646_vm0, %v2645_v2 }
 0x3fe   :  { %2350 = vmatprep.subr.bf16.mxu1 %v2645_v2 }
 0x3ff   :  { %v655_v22 = vpop.permute.xlu0 %654 }
 0x400   :  { %v660_v23 = vsel %vm312_vm5, %v655_v22, 0 }
 0x403   :  { %v653_v24 = vpop.permute.xlu0 %652 }
 0x4cf   :  { %v353_v6 = vpop.f32.mrb[4].mxu1 }
 0x4d0   :  { %v359_v7 = vmul.f32 0.25, %v353_v6  ;;  %v2342_v8 = vpop.f32.mrb[5].mxu1 }
 0x4d1   :  { %v356_v9 = vpop.f32.mrb[6].mxu1 }
 0x4d2   :  { %v2343_v10 = vpop.f32.mrb[7].mxu1  ;;  %v361_v11 = vsel %vm360_vm7, %v359_v7, -inf }
 0x4d3   :  { %362 = vmax.xlane.f32.xlu1 %v361_v11 }
 0x4e4   :  { %542 = vrot.lane.b32.xlu1 %v2857_v0, %s2649_s22 }
 0x560   :  { %v363_v12 = vpop.xlane.xlu1 %362 }
 0x561   :  { %v364_v13 = vsub.f32 %v359_v7, %v363_v12 }
 0x563   :  { %v365_v14 = vmul.f32 1.442695, %v364_v13 }
 0x564   :  { %v543_v19 = vpop.permute.xlu1 %542 }
 0x565   :  { %2562 = vpow2.f32 %v365_v14  ;;  %v548_v21 = vsel %vm312_vm5, %v543_v19, 0 }
 0x56f   :  { %v2874_v15 = vpop.eup %2562 }
 0x570   :  { %v370_v17 = vpack.c.bf16 %v2874_v15, %v2874_v15  ;;  %v367_v10 = vsel %vm360_vm7, %v2874_v15, 0.0 }
 0x572   :  { %2347 = vmatmul.mubr.msk.bf16.vlgmr.msra.gmra.mrb[8].mxu1 %vm360_vm7, %v370_v17 }
 0x573   :  { %2351 = vmatpush3.bf16.xpose.msra.mxu1 %v431_v18  ;;  %2352 = vmatprep.mubr.msk.bf16.mxu1 %vm2646_vm0, %v2645_v2 }
 0x574   :  { %2362 = vmatprep.subr.bf16.mxu1 %v2645_v2 }
 0x57a   :  { %2353 = vmatmul.mubr.msk.bf16.vlgmr.msra.gmra.mrb[12].mxu1 %vm312_vm5, %v424_v20 }
 0x57b   :  { %2363 = vmatpush3.bf16.xpose.msra.mxu1 %v548_v21  ;;  %2364 = vmatprep.mubr.msk.bf16.mxu1 %vm2646_vm0, %v2645_v2 }
 0x57c   :  { %2374 = vmatprep.subr.bf16.mxu1 %v2645_v2 }
 0x582   :  { %2365 = vmatmul.mubr.msk.bf16.vlgmr.msra.gmra.mrb[16].mxu1 %vm312_vm5, %v2857_v0 }
 0x583   :  { %2375 = vmatpush3.bf16.xpose.msra.mxu1 %v660_v23  ;;  %2376 = vmatprep.mubr.msk.bf16.mxu1 %vm2646_vm0, %v2645_v2 }
 0x584   :  { %2386 = vmatprep.subr.bf16.mxu1 %v2645_v2 }
 0x58a   :  { %2377 = vmatmul.mubr.msk.bf16.vlgmr.msra.gmra.mrb[20].mxu1 %vm312_vm5, %v653_v24 }
 0x58b   :  { %2390 = vmatprep.mubr.msk.bf16.mxu1 %vm2646_vm0, %v2645_v2 }
 0x645   :  { %v2897_v25 = vpop.f32.mrb[8].mxu1 }
 0x646   :  { %v2348_v26 = vpop.f32.mrb[9].mxu1 }
 0x647   :  { %v417_v27 = vpop.f32.mrb[10].mxu1 }
 0x648   :  { %v2349_v28 = vpop.f32.mrb[11].mxu1 }
 0x64d   :  { %v467_v29 = vpop.f32.mrb[12].mxu1 }
 0x64e   :  { %v473_v30 = vmul.f32 0.25, %v467_v29  ;;  %v2354_v31 = vpop.f32.mrb[13].mxu1 }
 0x64f   :  { %v470_v32 = vpop.f32.mrb[14].mxu1 }
 0x650   :  { %v2355_v33 = vpop.f32.mrb[15].mxu1  ;;  %v474_v34 = vsel %vm360_vm7, %v473_v30, -inf }
 0x651   :  { %475 = vmax.xlane.f32.xlu0 %v474_v34 }
 0x655   :  { %v584_v35 = vpop.f32.mrb[16].mxu1 }
 0x656   :  { %v590_v36 = vmul.f32 0.25, %v584_v35  ;;  %v2366_v37 = vpop.f32.mrb[17].mxu1 }
 0x657   :  { %v587_v38 = vpop.f32.mrb[18].mxu1 }
 0x658   :  { %v2367_v39 = vpop.f32.mrb[19].mxu1  ;;  %v591_v40 = vsel %vm360_vm7, %v590_v36, -inf }
 0x659   :  { %592 = vmax.xlane.f32.xlu1 %v591_v40 }
 0x65d   :  { %v696_v41 = vpop.f32.mrb[20].mxu1 }
 0x65e   :  { %v2378_v42 = vpop.f32.mrb[21].mxu1  ;;  %v702_v45 = vmul.f32 0.25, %v696_v41 }
 0x65f   :  { %v699_v43 = vpop.f32.mrb[22].mxu1  ;;  %v2151_v42 = vld [vmem:[%s3205_s8] ss:$0 sm:$0xff] }
 0x660   :  { %v2379_v44 = vpop.f32.mrb[23].mxu1  ;;  %v703_v46 = vsel %vm360_vm7, %v702_v45, -inf }
 0x667   :  { %484 = vrot.lane.b32.xlu0 %v2847_v61, %s2652_s2 }
 0x66a   :  { %601 = vrot.lane.b32.xlu1 %v2857_v0, %s2648_s5 }
 0x686   :  { %704 = vmax.xlane.f32.xlu0 %v703_v46 }
 0x69c   :  { %713 = vrot.lane.b32.xlu0 %v2857_v0, %s2652_s2 }
 0x6de   :  { %v476_v47 = vpop.xlane.xlu0 %475 }
 0x6df   :  { %v477_v48 = vsub.f32 %v473_v30, %v476_v47  ;;  %v2537_v30 = vld [vmem:[%s3204_s7 + $0x8] sm:$0xff]  }
 0x6e1   :  { %v478_v49 = vmul.f32 1.442695, %v477_v48 }
 0x6e2   :  { %v485_v50 = vpop.permute.xlu0 %484 }
 0x6e3   :  { %2564 = vpow2.f32 %v478_v49  ;;  %v490_v51 = vsel %vm376_vm6, %v485_v50, 0 }
 0x6e4   :  { %2357 = vmatpush3.bf16.msra.mxu0 %v490_v51 }
 0x6e5   :  { %2368 = vmatprep.subr.bf16.mxu0 %v2645_v2 }
 0x6e6   :  { %v593_v52 = vpop.xlane.xlu1 %592 }
 0x6e7   :  { %v594_v55 = vsub.f32 %v590_v36, %v593_v52 }
 0x6e9   :  { %v595_v56 = vmul.f32 1.442695, %v594_v55 }
 0x6ea   :  { %v602_v58 = vpop.permute.xlu1 %601 }
 0x6eb   :  { %2566 = vpow2.f32 %v595_v56  ;;  %v607_v61 = vsel %vm376_vm6, %v602_v58, 0 }
 0x6ed   :  { %v2565_v57 = vpop.eup %2564 }
 0x6ee   :  { %v480_v59 = vsel %vm360_vm7, %v2565_v57, 0.0  ;;  %v483_v60 = vpack.c.bf16 %v2565_v57, %v2565_v57 }
 0x6ef   :  { %481 = vadd.xlane.f32.xlu1 %v480_v59 }
 0x6f0   :  { %2359 = vmatmul.mubr.msk.bf16.vlgmr.msra.gmra.mrb[4].mxu0 %vm360_vm7, %v483_v60 }
 0x6f1   :  { %2369 = vmatpush3.bf16.msra.mxu0 %v607_v61  ;;  %2370 = vmatprep.mubr.msk.bf16.mxu0 %vm2646_vm0, %v2645_v2 }
 0x6f2   :  { %2380 = vmatprep.subr.bf16.mxu0 %v2645_v2 }
 0x6f5   :  { %v2567_v62 = vpop.eup %2566 }
 0x6f6   :  { %v597_v63 = vsel %vm360_vm7, %v2567_v62, 0.0  ;;  %v600_v0 = vpack.c.bf16 %v2567_v62, %v2567_v62 }
 0x6f7   :  { %598 = vadd.xlane.f32.xlu1 %v597_v63 }
 0x6f8   :  { %2371 = vmatmul.mubr.msk.bf16.vlgmr.msra.gmra.mrb[8].mxu0 %vm360_vm7, %v600_v0  ;;  %v2539_v0 = vld [vmem:[%s3208_s11 + $0x8] sm:$0xff]  }
 0x6f9   :  { %2382 = vmatprep.mubr.msk.bf16.mxu0 %vm2646_vm0, %v2645_v2 }
 0x713   :  { %v705_v1 = vpop.xlane.xlu0 %704 }
 0x714   :  { %v706_v3 = vsub.f32 %v702_v45, %v705_v1 }
 0x716   :  { %v707_v4 = vmul.f32 1.442695, %v706_v3 }
 0x717   :  { %v714_v5 = vpop.permute.xlu0 %713 }
 0x718   :  { %2568 = vpow2.f32 %v707_v4  ;;  %v719_v6 = vsel %vm376_vm6, %v714_v5, 0 }
 0x719   :  { %2381 = vmatpush3.bf16.msra.mxu0 %v719_v6 }
 0x71a   :  { %2394 = vmatprep.subr.bf16.mxu0 %v2645_v2 }
 0x722   :  { %v2569_v7 = vpop.eup %2568 }
 0x723   :  { %v709_v8 = vsel %vm360_vm7, %v2569_v7, 0.0  ;;  %v712_v9 = vpack.c.bf16 %v2569_v7, %v2569_v7 }
 0x724   :  { %710 = vadd.xlane.f32.xlu0 %v709_v8 }
 0x725   :  { %2383 = vmatmul.mubr.msk.bf16.vlgmr.msra.gmra.mrb[12].mxu0 %vm360_vm7, %v712_v9  ;;  %v2155_v9 = vld [vmem:[%s3206_s9] ss:$0 sm:$0xff] }
 0x726   :  { %2398 = vmatprep.mubr.msk.bf16.mxu0 %vm2646_vm0, %v2645_v2 }
 0x728   :  { %368 = vadd.xlane.f32.xlu0 %v367_v10 }
 0x77c   :  { %v482_v13 = vpop.xlane.xlu1 %481 }
 0x784   :  { %v599_v14 = vpop.xlane.xlu1 %598 }
 0x7b1   :  { %v711_v11 = vpop.xlane.xlu0 %710 }
 0x7b5   :  { %v369_v12 = vpop.xlane.xlu0 %368 }
 0x7b6   :  { %2570 = vrcp.f32 %v369_v12 }
 0x7b7   :  { %2572 = vrcp.f32 %v482_v13 }
 0x7b8   :  { %2574 = vrcp.f32 %v599_v14  ;;  %v2156_v14 = vld [vmem:[%s3207_s10] ss:$0 sm:$0xff] }
 0x7b9   :  { %2576 = vrcp.f32 %v711_v11 }
 0x7c0   :  { %v2571_v16 = vpop.eup %2570 }
 0x7c1   :  { %v421_v17 = vmul.f32 %v2571_v16, %v2897_v25  ;;  %v2573_v18 = vpop.eup %2572  ;;  %v2536_v25 = vld [vmem:[%s3204_s7] sm:$0xff]  }
 0x7c2   :  { %v2575_v23 = vpop.eup %2574  ;;  %2387 = vmatpush3.bf16.msra.mxu1 %v2536_v25 }
 0x7c3   :  { %v526_v19 = vpop.f32.mrb[4].mxu0  ;;  %422 = vst.msk [vmem:[#allocation2] sm:$0xff] %vm312_vm5, %v421_v17  ;;  %2388 = vmatprep.subr.bf16.mxu1 %v2645_v2  ;;  %v2577_v31 = vpop.eup %2576 }
 0x7c4   :  { %v533_v20 = vmul.f32 %v2573_v18, %v526_v19  ;;  %v2360_v21 = vpop.f32.mrb[5].mxu0 }
 0x7c5   :  { %v529_v22 = vpop.f32.mrb[6].mxu0  ;;  %v2541_v21 = vld [vmem:[%s3210_s13 + $0x8] sm:$0xff]  }
 0x7c6   :  { %535 = vrot.lane.b32.xlu0 %v533_v20, %s2653_s25  ;;  %v2361_v15 = vpop.f32.mrb[7].mxu0  ;;  %2389 = vmatpush3.bf16.msra.mxu1 %v2537_v30  ;;  %v2540_v20 = vld [vmem:[%s3210_s13] sm:$0xff]   ;;  %v2542_v22 = vld [vmem:[%s3210_s13 + $0x10] sm:$0xff]  }
 0x7c7   :  { %2402 = vmatprep.subr.bf16.mxu1 %v2645_v2  ;;  %v2543_v15 = vld [vmem:[%s3210_s13 + $0x18] sm:$0xff]  }
 0x7cb   :  { %v643_v24 = vpop.f32.mrb[8].mxu0 }
 0x7cc   :  { %v650_v26 = vmul.f32 %v2575_v23, %v643_v24  ;;  %v2372_v27 = vpop.f32.mrb[9].mxu0  ;;  %v2157_v23 = vld [vmem:[%s3209_s12] ss:$0 sm:$0xff] }
 0x7cd   :  { %v646_v28 = vpop.f32.mrb[10].mxu0 }
 0x7ce   :  { %651 = vst.msk [vmem:[#allocation2 + $0x8] sm:$0xff] %vm312_vm5, %v650_v26  ;;  %v2373_v29 = vpop.f32.mrb[11].mxu0 }
 0x7f8   :  { %v755_v32 = vpop.f32.mrb[12].mxu0 }
 0x7f9   :  { %v762_v33 = vmul.f32 %v2577_v31, %v755_v32  ;;  %v2384_v34 = vpop.f32.mrb[13].mxu0 }
 0x7fa   :  { %v758_v35 = vpop.f32.mrb[14].mxu0 }
 0x7fb   :  { %764 = vrot.lane.b32.xlu1 %v762_v33, %s2653_s25  ;;  %v2385_v36 = vpop.f32.mrb[15].mxu0 }
 0x838   :  { %v536_v37 = vpop.permute.xlu0 %535 }
 0x839   :  { %539 = vst.msk [vmem:[#allocation2] sm:$0xff] %vm538_vm8, %v536_v37 }
 0x840   :  { %v768_v39 = vld [vmem:[#allocation2] sm:$0xff] }
 0x86d   :  { %v765_v38 = vpop.permute.xlu1 %764 }
 0x86e   :  { %767 = vst.msk [vmem:[#allocation2 + $0x8] sm:$0xff] %vm538_vm8, %v765_v38 }
 0x875   :  { %v769_v40 = vld [vmem:[#allocation2 + $0x8] sm:$0xff] }
 0x876   :  { %v770_v41 = vpack.c.bf16 %v769_v40, %v768_v39 }
 0x878   :  { %2391 = vmatmul.mubr.msk.bf16.vlgmr.msra.gmra.mrb[24].mxu1 %vm196_vm4, %v770_v41 }
 0x879   :  { %2410 = vmatprep.mubr.msk.bf16.mxu1 %vm2646_vm0, %v2645_v2  ;;  %2403 = vmatpush3.bf16.msra.mxu1 %v2540_v20 }
 0x87a   :  { %2404 = vmatprep.subr.bf16.mxu1 %v2645_v2 }
 0x87d   :  { %2405 = vmatpush3.bf16.msra.mxu1 %v2541_v21 }
 0x87e   :  { %2406 = vmatprep.subr.bf16.mxu1 %v2645_v2 }
 0x881   :  { %2407 = vmatpush3.bf16.msra.mxu1 %v2542_v22  ;;  %v2168_v22 = vld [vmem:[%s3213_s16] ss:$0 sm:$0xff] }
 0x882   :  { %2408 = vmatprep.subr.bf16.mxu1 %v2645_v2 }
 0x885   :  { %2409 = vmatpush3.bf16.msra.mxu1 %v2543_v15 }
 0x886   :  { %2428 = vmatprep.subr.bf16.mxu1 %v2645_v2 }
 0x94b   :  { %v831_v43 = vpop.f32.mrb[24].mxu1 }
 0x94c   :  { %v832_v44 = vadd.f32 %v2151_v42, %v831_v43  ;;  %v2392_v45 = vpop.f32.mrb[25].mxu1 }
 0x94d   :  { %v834_v46 = vpop.f32.mrb[26].mxu1 }
 0x94e   :  { %v835_v47 = vadd.f32 %v2151_v42, %v834_v46  ;;  %v2393_v48 = vpop.f32.mrb[27].mxu1  ;;  %v838_v49 = vadd.f32 %v832_v44, %v2835_v53 }
 0x950   :  { %v842_v50 = vsel %vm196_vm4, %v838_v49, 0.0  ;;  %v839_v51 = vadd.f32 %v835_v47, %v2837_v54  ;;  %v2538_v54 = vld [vmem:[%s3208_s11] sm:$0xff]  }
 0x951   :  { %843 = vadd.xlane.f32.xlu1 %v842_v50  ;;  %2395 = vmatpush3.bf16.msra.mxu0 %v2538_v54 }
 0x952   :  { %v845_v52 = vsel %vm196_vm4, %v839_v51, 0.0  ;;  %2396 = vmatprep.subr.bf16.mxu0 %v2645_v2 }
 0x953   :  { %846 = vadd.xlane.f32.xlu0 %v845_v52 }
 0x955   :  { %2397 = vmatpush3.bf16.msra.mxu0 %v2539_v0 }
 0x956   :  { %2414 = vmatprep.subr.bf16.mxu0 %v2645_v2 }
 0x9de   :  { %v844_v55 = vpop.xlane.xlu1 %843 }
 0x9df   :  { %v848_v56 = vmul.f32 0.03125, %v844_v55 }
 0x9e0   :  { %v847_v57 = vpop.xlane.xlu0 %846 }
 0x9e1   :  { %v850_v58 = vsub.f32 %v838_v49, %v848_v56  ;;  %v849_v59 = vmul.f32 0.03125, %v847_v57  ;;  %v2161_v49 = vld [vmem:[%s3211_s14] ss:$0 sm:$0xff] }
 0x9e3   :  { %v851_v60 = vsub.f32 %v839_v51, %v849_v59  ;;  %v852_v61 = vmul.f32 %v850_v58, %v850_v58 }
 0x9e5   :  { %v854_v62 = vsel %vm196_vm4, %v852_v61, 0.0  ;;  %v853_v63 = vmul.f32 %v851_v60, %v851_v60 }
 0x9e6   :  { %855 = vadd.xlane.f32.xlu0 %v854_v62 }
 0x9e7   :  { %v857_v53 = vsel %vm196_vm4, %v853_v63, 0.0 }
 0x9e8   :  { %858 = vadd.xlane.f32.xlu1 %v857_v53 }
 0xa73   :  { %v856_v1 = vpop.xlane.xlu0 %855 }
 0xa74   :  { %v860_v3 = vmul.f32 0.03125, %v856_v1 }
 0xa75   :  { %v859_v4 = vpop.xlane.xlu1 %858 }
 0xa76   :  { %v862_v5 = vadd.f32 1e-12, %v860_v3  ;;  %v861_v6 = vmul.f32 0.03125, %v859_v4 }
 0xa78   :  { %2578 = vrsqrt.f32 %v862_v5  ;;  %v863_v7 = vadd.f32 1e-12, %v861_v6 }
 0xa7a   :  { %2580 = vrsqrt.f32 %v863_v7  ;;  %v2544_v7 = vld [vmem:[%s3232_s24 + $0x10] sm:$0xff]  }
 0xa82   :  { %v2579_v8 = vpop.eup %2578 }
 0xa83   :  { %v866_v10 = vmul.f32 %v2579_v8, %v850_v58  ;;  %v2545_v8 = vld [vmem:[%s3232_s24 + $0x18] sm:$0xff]  }
 0xa84   :  { %v2581_v11 = vpop.eup %2580 }
 0xa85   :  { %v874_v12 = vmul.f32 %v2155_v9, %v866_v10  ;;  %v867_v13 = vmul.f32 %v2581_v11, %v851_v60 }
 0xa87   :  { %v875_v16 = vmul.f32 %v2155_v9, %v867_v13  ;;  %v882_v17 = vadd.f32 %v2156_v14, %v874_v12 }
 0xa89   :  { %v883_v18 = vadd.f32 %v2156_v14, %v875_v16 }
 0xa8b   :  { %v884_v19 = vpack.c.bf16 %v883_v18, %v882_v17 }
 0xa8d   :  { %2399 = vmatmul.mubr.msk.bf16.vlgmr.msra.gmra.mrb[16].mxu0 %vm196_vm4, %v884_v19 }
 0xa8e   :  { %2418 = vmatprep.mubr.msk.bf16.mxu0 %vm2646_vm0, %v2645_v2  ;;  %2415 = vmatpush3.bf16.msra.mxu0 %v2544_v7 }
 0xa8f   :  { %2416 = vmatprep.subr.bf16.mxu0 %v2645_v2 }
 0xa92   :  { %2417 = vmatpush3.bf16.msra.mxu0 %v2545_v8 }
 0xa93   :  { %2422 = vmatprep.subr.bf16.mxu0 %v2645_v2 }
 0xb60   :  { %v945_v24 = vpop.f32.mrb[16].mxu0 }
 0xb61   :  { %v946_v26 = vadd.f32 %v2157_v23, %v945_v24  ;;  %v2400_v27 = vpop.f32.mrb[17].mxu0 }
 0xb62   :  { %v948_v28 = vpop.f32.mrb[18].mxu0  ;;  %v2174_v27 = vld [vmem:[%s3203_s6 + $0x1] ss:$0 sm:$0xff] }
 0xb63   :  { %v954_v29 = vmul.f32 0.044715, %v946_v26  ;;  %v949_v25 = vadd.f32 %v2157_v23, %v948_v28  ;;  %v2401_v30 = vpop.f32.mrb[19].mxu0  ;;  %v952_v43 = vmul.f32 0.5, %v946_v26 }
 0xb65   :  { %v956_v31 = vmul.f32 %v954_v29, %v946_v26  ;;  %v955_v32 = vmul.f32 0.044715, %v949_v25  ;;  %v953_v44 = vmul.f32 0.5, %v949_v25 }
 0xb67   :  { %v958_v33 = vmul.f32 %v956_v31, %v946_v26  ;;  %v957_v34 = vmul.f32 %v955_v32, %v949_v25 }
 0xb69   :  { %v960_v35 = vadd.f32 %v958_v33, %v946_v26  ;;  %v959_v36 = vmul.f32 %v957_v34, %v949_v25 }
 0xb6b   :  { %v962_v37 = vmul.f32 0.7978846, %v960_v35  ;;  %v961_v38 = vadd.f32 %v959_v36, %v949_v25 }
 0xb6d   :  { %2582 = vtanh.f32 %v962_v37  ;;  %v963_v39 = vmul.f32 0.7978846, %v961_v38 }
 0xb6f   :  { %2584 = vtanh.f32 %v963_v39 }
 0xb77   :  { %v2583_v40 = vpop.eup %2582 }
 0xb78   :  { %v966_v41 = vadd.f32 1.0, %v2583_v40 }
 0xb79   :  { %v2585_v42 = vpop.eup %2584 }
 0xb7a   :  { %v967_v45 = vadd.f32 1.0, %v2585_v42  ;;  %v968_v46 = vmul.f32 %v966_v41, %v952_v43 }
 0xb7c   :  { %v969_v47 = vmul.f32 %v967_v45, %v953_v44 }
 0xb7e   :  { %v970_v48 = vpack.c.bf16 %v969_v47, %v968_v46 }
 0xb80   :  { %2411 = vmatmul.mubr.msk.bf16.vlgmr.msra.gmra.mrb[28].mxu1 %vm1010_vm9, %v970_v48 }
 0xb81   :  { %2430 = vmatprep.mubr.msk.bf16.mxu1 %vm2646_vm0, %v2645_v2 }
 0xc53   :  { %v1048_v50 = vpop.f32.mrb[28].mxu1 }
 0xc54   :  { %v1049_v51 = vadd.f32 %v2161_v49, %v1048_v50  ;;  %v2412_v52 = vpop.f32.mrb[29].mxu1 }
 0xc55   :  { %v1051_v55 = vpop.f32.mrb[30].mxu1 }
 0xc56   :  { %v1052_v56 = vadd.f32 %v2161_v49, %v1051_v55  ;;  %v2413_v57 = vpop.f32.mrb[31].mxu1  ;;  %v1055_v58 = vadd.f32 %v1049_v51, %v882_v17  ;;  %v2167_v17 = vld [vmem:[%s3212_s15] ss:$0 sm:$0xff] }
 0xc58   :  { %v1059_v59 = vsel %vm196_vm4, %v1055_v58, 0.0  ;;  %v1056_v60 = vadd.f32 %v1052_v56, %v883_v18 }
 0xc59   :  { %1060 = vadd.xlane.f32.xlu0 %v1059_v59 }
 0xc5a   :  { %v1062_v61 = vsel %vm196_vm4, %v1056_v60, 0.0 }
 0xc5b   :  { %1063 = vadd.xlane.f32.xlu1 %v1062_v61 }
 0xce6   :  { %v1061_v62 = vpop.xlane.xlu0 %1060 }
 0xce7   :  { %v1065_v63 = vmul.f32 0.03125, %v1061_v62 }
 0xce8   :  { %v1064_v53 = vpop.xlane.xlu1 %1063 }
 0xce9   :  { %v1067_v54 = vsub.f32 %v1055_v58, %v1065_v63  ;;  %v1066_v0 = vmul.f32 0.03125, %v1064_v53 }
 0xceb   :  { %v1068_v1 = vsub.f32 %v1056_v60, %v1066_v0  ;;  %v1069_v3 = vmul.f32 %v1067_v54, %v1067_v54 }
 0xced   :  { %v1071_v4 = vsel %vm196_vm4, %v1069_v3, 0.0  ;;  %v1070_v5 = vmul.f32 %v1068_v1, %v1068_v1 }
 0xcee   :  { %1072 = vadd.xlane.f32.xlu0 %v1071_v4 }
 0xcef   :  { %v1074_v6 = vsel %vm196_vm4, %v1070_v5, 0.0 }
 0xcf0   :  { %1075 = vadd.xlane.f32.xlu1 %v1074_v6 }
 0xd7b   :  { %v1073_v9 = vpop.xlane.xlu0 %1072 }
 0xd7c   :  { %v1077_v10 = vmul.f32 0.03125, %v1073_v9 }
 0xd7d   :  { %v1076_v11 = vpop.xlane.xlu1 %1075 }
 0xd7e   :  { %v1079_v12 = vadd.f32 1e-12, %v1077_v10  ;;  %v1078_v13 = vmul.f32 0.03125, %v1076_v11 }
 0xd80   :  { %2586 = vrsqrt.f32 %v1079_v12  ;;  %v1080_v14 = vadd.f32 1e-12, %v1078_v13 }
 0xd82   :  { %2588 = vrsqrt.f32 %v1080_v14 }
 0xd8a   :  { %v2587_v16 = vpop.eup %2586 }
 0xd8b   :  { %v1083_v18 = vmul.f32 %v2587_v16, %v1067_v54 }
 0xd8c   :  { %v2589_v19 = vpop.eup %2588 }
 0xd8d   :  { %v1091_v20 = vmul.f32 %v2167_v17, %v1083_v18  ;;  %v1084_v21 = vmul.f32 %v2589_v19, %v1068_v1 }
 0xd8f   :  { %v1092_v15 = vmul.f32 %v2167_v17, %v1084_v21  ;;  %v3015_v23 = vadd.f32 %v2168_v22, %v1091_v20 }
 0xd91   :  { %v3017_v24 = vadd.f32 %v2168_v22, %v1092_v15 }
 0xd93   :  { %v1101_v26 = vpack.c.bf16 %v3017_v24, %v3015_v23 }
 0xd95   :  { %2419 = vmatmul.mubr.msk.bf16.vlgmr.msra.gmra.mrb[20].mxu0 %vm196_vm4, %v1101_v26 }
 0xd96   :  { %2424 = vmatprep.mubr.msk.bf16.mxu0 %vm2646_vm0, %v2645_v2 }
 0xe68   :  { %v1164_v28 = vpop.f32.mrb[20].mxu0 }
 0xe69   :  { %v1165_v29 = vadd.f32 %v2174_v27, %v1164_v28  ;;  %v2420_v25 = vpop.f32.mrb[21].mxu0 }
 0xe6a   :  { %v1167_v30 = vpop.f32.mrb[22].mxu0 }
 0xe6b   :  { %v1171_v31 = vpack.c.bf16 %v1165_v29, %v1165_v29  ;;  %v1168_v32 = vadd.f32 %v2174_v27, %v1167_v30  ;;  %v2421_v33 = vpop.f32.mrb[23].mxu0 }
 0xe6d   :  { %1285 = vrot.lane.b32.xlu1 %v1171_v31, %s2650_s23  ;;  %1173 = vrot.lane.b32.xlu0 %v1171_v31, %s2649_s22  ;;  %v1399_v34 = vpack.c.bf16 %v1168_v32, %v1168_v32 }
 0xe71   :  { %1283 = vrot.lane.b32.xlu1 %v1171_v31, %s2651_s1  ;;  %1401 = vrot.lane.b32.xlu0 %v1399_v34, %s2649_s22 }
 0xe75   :  { %1513 = vrot.lane.b32.xlu1 %v1399_v34, %s2650_s23  ;;  %1511 = vrot.lane.b32.xlu0 %v1399_v34, %s2651_s1 }
 0xedf   :  { %v1174_v35 = vpop.permute.xlu0 %1173  ;;  %v1286_v37 = vpop.permute.xlu1 %1285 }
 0xee0   :  { %v1179_v36 = vsel %vm312_vm5, %v1174_v35, 0  ;;  %v1291_v38 = vsel %vm312_vm5, %v1286_v37, 0 }
 0xee1   :  { %2423 = vmatpush3.bf16.xpose.msra.mxu0 %v1179_v36 }
 0xee2   :  { %2434 = vmatprep.subr.bf16.mxu0 %v2645_v2 }
 0xee3   :  { %v1402_v39 = vpop.permute.xlu0 %1401  ;;  %v1284_v40 = vpop.permute.xlu1 %1283 }
 0xee4   :  { %v1407_v41 = vsel %vm312_vm5, %v1402_v39, 0 }
 0xee7   :  { %v1514_v42 = vpop.permute.xlu1 %1513  ;;  %v1512_v44 = vpop.permute.xlu0 %1511 }
 0xee8   :  { %2425 = vmatmul.mubr.msk.bf16.vlgmr.msra.gmra.mrb[24].mxu0 %vm312_vm5, %v1171_v31  ;;  %v1519_v43 = vsel %vm312_vm5, %v1514_v42, 0 }
 0xee9   :  { %2435 = vmatpush3.bf16.xpose.msra.mxu0 %v1291_v38  ;;  %2436 = vmatprep.mubr.msk.bf16.mxu0 %vm2646_vm0, %v2645_v2 }
 0xeea   :  { %2446 = vmatprep.subr.bf16.mxu0 %v2645_v2 }
 0xef0   :  { %2437 = vmatmul.mubr.msk.bf16.vlgmr.msra.gmra.mrb[28].mxu0 %vm312_vm5, %v1284_v40 }
 0xef1   :  { %2447 = vmatpush3.bf16.xpose.msra.mxu0 %v1407_v41  ;;  %2448 = vmatprep.mubr.msk.bf16.mxu0 %vm2646_vm0, %v2645_v2 }
 0xef2   :  { %2458 = vmatprep.subr.bf16.mxu0 %v2645_v2 }
 0xef8   :  { %2449 = vmatmul.mubr.msk.bf16.vlgmr.msra.gmra.mrb[32].mxu0 %vm312_vm5, %v1399_v34 }
 0xef9   :  { %2459 = vmatpush3.bf16.xpose.msra.mxu0 %v1519_v43  ;;  %2460 = vmatprep.mubr.msk.bf16.mxu0 %vm2646_vm0, %v2645_v2 }
 0xefa   :  { %2470 = vmatprep.subr.bf16.mxu0 %v2645_v2 }
 0xf00   :  { %2461 = vmatmul.mubr.msk.bf16.vlgmr.msra.gmra.mrb[36].mxu0 %vm312_vm5, %v1512_v44 }
 0xf01   :  { %2474 = vmatprep.mubr.msk.bf16.mxu0 %vm2646_vm0, %v2645_v2 }
 0xfbb   :  { %v1215_v45 = vpop.f32.mrb[24].mxu0 }
 0xfbc   :  { %v1221_v46 = vmul.f32 0.25, %v1215_v45  ;;  %v2426_v47 = vpop.f32.mrb[25].mxu0 }
 0xfbd   :  { %v1218_v48 = vpop.f32.mrb[26].mxu0 }
 0xfbe   :  { %v2427_v49 = vpop.f32.mrb[27].mxu0  ;;  %v1222_v50 = vsel %vm360_vm7, %v1221_v46, -inf }
 0xfbf   :  { %1223 = vmax.xlane.f32.xlu1 %v1222_v50 }
 0xfc3   :  { %v1327_v51 = vpop.f32.mrb[28].mxu0 }
 0xfc4   :  { %v1333_v52 = vmul.f32 0.25, %v1327_v51  ;;  %v2438_v55 = vpop.f32.mrb[29].mxu0 }
 0xfc5   :  { %v1330_v56 = vpop.f32.mrb[30].mxu0 }
 0xfc6   :  { %v2439_v57 = vpop.f32.mrb[31].mxu0  ;;  %v1334_v58 = vsel %vm360_vm7, %v1333_v52, -inf }
 0xfc7   :  { %1335 = vmax.xlane.f32.xlu0 %v1334_v58  ;;  %v2546_v58 = vld [vmem:[%s3204_s7 + $0x10] sm:$0xff]  }
 0xfc8   :  { %2471 = vmatpush3.bf16.msra.mxu0 %v2546_v58  ;;  %v2204_v58 = vld [vmem:[%s3209_s12 + $0x1] ss:$0 sm:$0xff] }
 0xfc9   :  { %2472 = vmatprep.subr.bf16.mxu0 %v2645_v2 }
 0xfcb   :  { %v1443_v59 = vpop.f32.mrb[32].mxu0 }
 0xfcc   :  { %v1449_v60 = vmul.f32 0.25, %v1443_v59  ;;  %v2450_v61 = vpop.f32.mrb[33].mxu0 }
 0xfcd   :  { %v1446_v62 = vpop.f32.mrb[34].mxu0 }
 0xfce   :  { %v2451_v63 = vpop.f32.mrb[35].mxu0  ;;  %v1450_v53 = vsel %vm360_vm7, %v1449_v60, -inf }
 0xfcf   :  { %1451 = vmax.xlane.f32.xlu0 %v1450_v53  ;;  %v2547_v63 = vld [vmem:[%s3204_s7 + $0x18] sm:$0xff]  }
 0xfd0   :  { %1344 = vrot.lane.b32.xlu1 %v1171_v31, %s2652_s2  ;;  %2473 = vmatpush3.bf16.msra.mxu0 %v2547_v63 }
 0xfd1   :  { %2486 = vmatprep.subr.bf16.mxu0 %v2645_v2 }
 0xfd3   :  { %v1555_v54 = vpop.f32.mrb[36].mxu0 }
 0xfd4   :  { %v2462_v0 = vpop.f32.mrb[37].mxu0  ;;  %v1561_v4 = vmul.f32 0.25, %v1555_v54 }
 0xfd5   :  { %v1558_v1 = vpop.f32.mrb[38].mxu0 }
 0xfd6   :  { %v2463_v3 = vpop.f32.mrb[39].mxu0  ;;  %v1562_v5 = vsel %vm360_vm7, %v1561_v4, -inf }
 0xfe5   :  { %1232 = vrot.lane.b32.xlu0 %v1171_v31, %s2648_s5 }
 0xfe9   :  { %1572 = vrot.lane.b32.xlu0 %v1399_v34, %s2652_s2 }
 0xff4   :  { %1563 = vmax.xlane.f32.xlu1 %v1562_v5 }
0x1005   :  { %1460 = vrot.lane.b32.xlu1 %v1399_v34, %s2648_s5 }
0x104c   :  { %v1224_v6 = vpop.xlane.xlu1 %1223 }
0x104d   :  { %v1225_v7 = vsub.f32 %v1221_v46, %v1224_v6 }
0x104f   :  { %v1226_v8 = vmul.f32 1.442695, %v1225_v7 }
0x1050   :  { %v1345_v19 = vpop.permute.xlu1 %1344 }
0x1051   :  { %2590 = vpow2.f32 %v1226_v8  ;;  %v1350_v15 = vsel %vm376_vm6, %v1345_v19, 0 }
0x1054   :  { %v1336_v9 = vpop.xlane.xlu0 %1335 }
0x1055   :  { %v1337_v10 = vsub.f32 %v1333_v52, %v1336_v9 }
0x1057   :  { %v1338_v11 = vmul.f32 1.442695, %v1337_v10 }
0x1059   :  { %2592 = vpow2.f32 %v1338_v11 }
0x105b   :  { %v2591_v16 = vpop.eup %2590 }
0x105c   :  { %v1452_v12 = vpop.xlane.xlu0 %1451  ;;  %v1231_v21 = vpack.c.bf16 %v2591_v16, %v2591_v16  ;;  %v1228_v39 = vsel %vm360_vm7, %v2591_v16, 0.0 }
0x105d   :  { %v1453_v13 = vsub.f32 %v1449_v60, %v1452_v12  ;;  %v2191_v12 = vld [vmem:[%s3205_s8 + $0x1] ss:$0 sm:$0xff] }
0x105f   :  { %v1454_v14 = vmul.f32 1.442695, %v1453_v13 }
0x1060   :  { %v1233_v17 = vpop.permute.xlu0 %1232 }
0x1061   :  { %2594 = vpow2.f32 %v1454_v14  ;;  %v1238_v18 = vsel %vm376_vm6, %v1233_v17, 0 }
0x1062   :  { %2429 = vmatpush3.bf16.msra.mxu1 %v1238_v18 }
0x1063   :  { %v2593_v20 = vpop.eup %2592  ;;  %2440 = vmatprep.subr.bf16.mxu1 %v2645_v2 }
0x1064   :  { %v1340_v22 = vsel %vm360_vm7, %v2593_v20, 0.0  ;;  %v1343_v27 = vpack.c.bf16 %v2593_v20, %v2593_v20  ;;  %v1573_v33 = vpop.permute.xlu0 %1572 }
0x1065   :  { %2431 = vmatmul.mubr.msk.bf16.vlgmr.msra.gmra.mrb[32].mxu1 %vm360_vm7, %v1231_v21  ;;  %1341 = vadd.xlane.f32.xlu1 %v1340_v22  ;;  %v1578_v35 = vsel %vm376_vm6, %v1573_v33, 0 }
0x1066   :  { %2441 = vmatpush3.bf16.msra.mxu1 %v1350_v15  ;;  %2442 = vmatprep.mubr.msk.bf16.mxu1 %vm2646_vm0, %v2645_v2 }
0x1067   :  { %2452 = vmatprep.subr.bf16.mxu1 %v2645_v2 }
0x106b   :  { %v2595_v26 = vpop.eup %2594 }
0x106c   :  { %v1456_v28 = vsel %vm360_vm7, %v2595_v26, 0.0  ;;  %v1459_v34 = vpack.c.bf16 %v2595_v26, %v2595_v26 }
0x106d   :  { %2443 = vmatmul.mubr.msk.bf16.vlgmr.msra.gmra.mrb[36].mxu1 %vm360_vm7, %v1343_v27  ;;  %1457 = vadd.xlane.f32.xlu1 %v1456_v28 }
0x106e   :  { %2454 = vmatprep.mubr.msk.bf16.mxu1 %vm2646_vm0, %v2645_v2 }
0x1081   :  { %v1564_v29 = vpop.xlane.xlu1 %1563 }
0x1082   :  { %v1565_v25 = vsub.f32 %v1561_v4, %v1564_v29 }
0x1084   :  { %v1566_v30 = vmul.f32 1.442695, %v1565_v25 }
0x1085   :  { %v1461_v31 = vpop.permute.xlu1 %1460 }
0x1086   :  { %2596 = vpow2.f32 %v1566_v30  ;;  %v1466_v32 = vsel %vm376_vm6, %v1461_v31, 0 }
0x1087   :  { %2453 = vmatpush3.bf16.msra.mxu1 %v1466_v32 }
0x1088   :  { %2464 = vmatprep.subr.bf16.mxu1 %v2645_v2 }
0x108a   :  { %2455 = vmatmul.mubr.msk.bf16.vlgmr.msra.gmra.mrb[40].mxu1 %vm360_vm7, %v1459_v34  ;;  %v2549_v34 = vld [vmem:[%s3208_s11 + $0x18] sm:$0xff]  }
0x108b   :  { %2465 = vmatpush3.bf16.msra.mxu1 %v1578_v35  ;;  %2466 = vmatprep.mubr.msk.bf16.mxu1 %vm2646_vm0, %v2645_v2 }
0x108c   :  { %2478 = vmatprep.subr.bf16.mxu1 %v2645_v2 }
0x1090   :  { %v2597_v36 = vpop.eup %2596 }
0x1091   :  { %v1568_v37 = vsel %vm360_vm7, %v2597_v36, 0.0  ;;  %v1571_v38 = vpack.c.bf16 %v2597_v36, %v2597_v36 }
0x1092   :  { %1569 = vadd.xlane.f32.xlu0 %v1568_v37 }
0x1093   :  { %2467 = vmatmul.mubr.msk.bf16.vlgmr.msra.gmra.mrb[44].mxu1 %vm360_vm7, %v1571_v38 }
0x1094   :  { %2482 = vmatprep.mubr.msk.bf16.mxu1 %vm2646_vm0, %v2645_v2 }
0x1096   :  { %1229 = vadd.xlane.f32.xlu0 %v1228_v39 }
0x10f2   :  { %v1342_v42 = vpop.xlane.xlu1 %1341 }
0x10fa   :  { %v1458_v57 = vpop.xlane.xlu1 %1457 }
0x111f   :  { %v1570_v40 = vpop.xlane.xlu0 %1569 }
0x1123   :  { %v1230_v41 = vpop.xlane.xlu0 %1229 }
0x1124   :  { %2598 = vrcp.f32 %v1230_v41 }
0x1125   :  { %2600 = vrcp.f32 %v1342_v42  ;;  %v2197_v42 = vld [vmem:[%s3206_s9 + $0x1] ss:$0 sm:$0xff] }
0x1126   :  { %2602 = vrcp.f32 %v1458_v57  ;;  %v2553_v57 = vld [vmem:[%s3210_s13 + $0x38] sm:$0xff]  }
0x1127   :  { %2604 = vrcp.f32 %v1570_v40 }
0x112e   :  { %v2599_v43 = vpop.eup %2598 }
0x112f   :  { %v2601_v49 = vpop.eup %2600 }
0x1130   :  { %v2603_v59 = vpop.eup %2602 }
0x1131   :  { %v2605_v0 = vpop.eup %2604 }
0x1138   :  { %v1274_v44 = vpop.f32.mrb[32].mxu1 }
0x1139   :  { %v1281_v45 = vmul.f32 %v2599_v43, %v1274_v44  ;;  %v2432_v46 = vpop.f32.mrb[33].mxu1 }
0x113a   :  { %v1277_v47 = vpop.f32.mrb[34].mxu1 }
0x113b   :  { %1282 = vst.msk [vmem:[#allocation2] sm:$0xff] %vm312_vm5, %v1281_v45  ;;  %v2433_v48 = vpop.f32.mrb[35].mxu1  ;;  %v2198_v47 = vld [vmem:[%s3207_s10 + $0x1] ss:$0 sm:$0xff] }
0x1140   :  { %v1386_v50 = vpop.f32.mrb[36].mxu1 }
0x1141   :  { %v1393_v51 = vmul.f32 %v2601_v49, %v1386_v50  ;;  %v2444_v52 = vpop.f32.mrb[37].mxu1 }
0x1142   :  { %v1389_v55 = vpop.f32.mrb[38].mxu1  ;;  %v2550_v52 = vld [vmem:[%s3210_s13 + $0x20] sm:$0xff]  }
0x1143   :  { %v2445_v56 = vpop.f32.mrb[39].mxu1  ;;  %1395 = vrot.lane.b32.xlu0 %v1393_v51, %s2653_s25  ;;  %v2551_v55 = vld [vmem:[%s3210_s13 + $0x28] sm:$0xff]  }
0x1144   :  { %v2552_v56 = vld [vmem:[%s3210_s13 + $0x30] sm:$0xff]  }
0x115d   :  { %v1502_v60 = vpop.f32.mrb[40].mxu1 }
0x115e   :  { %v1509_v61 = vmul.f32 %v2603_v59, %v1502_v60  ;;  %v2456_v62 = vpop.f32.mrb[41].mxu1 }
0x115f   :  { %v1505_v53 = vpop.f32.mrb[42].mxu1 }
0x1160   :  { %1510 = vst.msk [vmem:[#allocation2 + $0x8] sm:$0xff] %vm312_vm5, %v1509_v61  ;;  %v2457_v54 = vpop.f32.mrb[43].mxu1 }
0x1166   :  { %v1614_v1 = vpop.f32.mrb[44].mxu1 }
0x1167   :  { %v1621_v3 = vmul.f32 %v2605_v0, %v1614_v1  ;;  %v2468_v4 = vpop.f32.mrb[45].mxu1 }
0x1168   :  { %v1617_v5 = vpop.f32.mrb[46].mxu1 }
0x1169   :  { %1623 = vrot.lane.b32.xlu1 %v1621_v3, %s2653_s25  ;;  %v2469_v6 = vpop.f32.mrb[47].mxu1 }
0x11b5   :  { %v1396_v7 = vpop.permute.xlu0 %1395 }
0x11b6   :  { %1398 = vst.msk [vmem:[#allocation2] sm:$0xff] %vm538_vm8, %v1396_v7 }
0x11bd   :  { %v1627_v9 = vld [vmem:[#allocation2] sm:$0xff] }
0x11db   :  { %v1624_v8 = vpop.permute.xlu1 %1623 }
0x11dc   :  { %1626 = vst.msk [vmem:[#allocation2 + $0x8] sm:$0xff] %vm538_vm8, %v1624_v8 }
0x11e3   :  { %v1628_v10 = vld [vmem:[#allocation2 + $0x8] sm:$0xff] }
0x11e4   :  { %v1629_v11 = vpack.c.bf16 %v1628_v10, %v1627_v9 }
0x11e6   :  { %2475 = vmatmul.mubr.msk.bf16.vlgmr.msra.gmra.mrb[40].mxu0 %vm196_vm4, %v1629_v11 }
0x11e7   :  { %2494 = vmatprep.mubr.msk.bf16.mxu0 %vm2646_vm0, %v2645_v2  ;;  %2487 = vmatpush3.bf16.msra.mxu0 %v2550_v52 }
0x11e8   :  { %2488 = vmatprep.subr.bf16.mxu0 %v2645_v2 }
0x11eb   :  { %2489 = vmatpush3.bf16.msra.mxu0 %v2551_v55 }
0x11ec   :  { %2490 = vmatprep.subr.bf16.mxu0 %v2645_v2 }
0x11ef   :  { %2491 = vmatpush3.bf16.msra.mxu0 %v2552_v56 }
0x11f0   :  { %2492 = vmatprep.subr.bf16.mxu0 %v2645_v2 }
0x11f3   :  { %2493 = vmatpush3.bf16.msra.mxu0 %v2553_v57  ;;  %v2226_v57 = vld [vmem:[%s3213_s16 + $0x1] ss:$0 sm:$0xff] }
0x12b9   :  { %v1692_v13 = vpop.f32.mrb[40].mxu0 }
0x12ba   :  { %v1693_v14 = vadd.f32 %v2191_v12, %v1692_v13  ;;  %v2476_v16 = vpop.f32.mrb[41].mxu0 }
0x12bb   :  { %v1695_v17 = vpop.f32.mrb[42].mxu0 }
0x12bc   :  { %v1696_v18 = vadd.f32 %v2191_v12, %v1695_v17  ;;  %v2477_v19 = vpop.f32.mrb[43].mxu0  ;;  %v1699_v20 = vadd.f32 %v1693_v14, %v3015_v23 }
0x12be   :  { %v1705_v21 = vsel %vm196_vm4, %v1699_v20, 0.0  ;;  %v1700_v22 = vadd.f32 %v1696_v18, %v3017_v24  ;;  %v2548_v24 = vld [vmem:[%s3208_s11 + $0x10] sm:$0xff]  }
0x12bf   :  { %1706 = vadd.xlane.f32.xlu1 %v1705_v21  ;;  %2479 = vmatpush3.bf16.msra.mxu1 %v2548_v24 }
0x12c0   :  { %v1708_v15 = vsel %vm196_vm4, %v1700_v22, 0.0  ;;  %2480 = vmatprep.subr.bf16.mxu1 %v2645_v2 }
0x12c1   :  { %1709 = vadd.xlane.f32.xlu0 %v1708_v15 }
0x12c3   :  { %2481 = vmatpush3.bf16.msra.mxu1 %v2549_v34 }
0x12c4   :  { %2498 = vmatprep.subr.bf16.mxu1 %v2645_v2 }
0x134c   :  { %v1707_v26 = vpop.xlane.xlu1 %1706 }
0x134d   :  { %v1711_v27 = vmul.f32 0.03125, %v1707_v26 }
0x134e   :  { %v1710_v28 = vpop.xlane.xlu0 %1709 }
0x134f   :  { %v1713_v29 = vsub.f32 %v1699_v20, %v1711_v27  ;;  %v1712_v25 = vmul.f32 0.03125, %v1710_v28  ;;  %v2217_v20 = vld [vmem:[%s3211_s14 + $0x1] ss:$0 sm:$0xff] }
0x1351   :  { %v1714_v30 = vsub.f32 %v1700_v22, %v1712_v25  ;;  %v1715_v31 = vmul.f32 %v1713_v29, %v1713_v29 }
0x1353   :  { %v1717_v32 = vsel %vm196_vm4, %v1715_v31, 0.0  ;;  %v1716_v33 = vmul.f32 %v1714_v30, %v1714_v30 }
0x1354   :  { %1718 = vadd.xlane.f32.xlu0 %v1717_v32 }
0x1355   :  { %v1720_v23 = vsel %vm196_vm4, %v1716_v33, 0.0 }
0x1356   :  { %1721 = vadd.xlane.f32.xlu1 %v1720_v23 }
0x13e1   :  { %v1719_v35 = vpop.xlane.xlu0 %1718 }
0x13e2   :  { %v1723_v36 = vmul.f32 0.03125, %v1719_v35 }
0x13e3   :  { %v1722_v37 = vpop.xlane.xlu1 %1721 }
0x13e4   :  { %v1725_v38 = vadd.f32 1e-12, %v1723_v36  ;;  %v1724_v39 = vmul.f32 0.03125, %v1722_v37 }
0x13e6   :  { %2606 = vrsqrt.f32 %v1725_v38  ;;  %v1726_v40 = vadd.f32 1e-12, %v1724_v39 }
0x13e8   :  { %2608 = vrsqrt.f32 %v1726_v40  ;;  %v2554_v40 = vld [vmem:[%s3214_s17] sm:$0xff]  }
0x13f0   :  { %v2607_v41 = vpop.eup %2606 }
0x13f1   :  { %v1729_v43 = vmul.f32 %v2607_v41, %v1713_v29  ;;  %v2555_v41 = vld [vmem:[%s3214_s17 + $0x8] sm:$0xff]  }
0x13f2   :  { %v2609_v44 = vpop.eup %2608 }
0x13f3   :  { %v1737_v45 = vmul.f32 %v2197_v42, %v1729_v43  ;;  %v1730_v46 = vmul.f32 %v2609_v44, %v1714_v30 }
0x13f5   :  { %v1738_v48 = vmul.f32 %v2197_v42, %v1730_v46  ;;  %v1745_v49 = vadd.f32 %v2198_v47, %v1737_v45 }
0x13f7   :  { %v1746_v50 = vadd.f32 %v2198_v47, %v1738_v48 }
0x13f9   :  { %v1747_v51 = vpack.c.bf16 %v1746_v50, %v1745_v49 }
0x13fb   :  { %2483 = vmatmul.mubr.msk.bf16.vlgmr.msra.gmra.mrb[48].mxu1 %vm196_vm4, %v1747_v51  ;;  %v2225_v51 = vld [vmem:[%s3212_s15 + $0x1] ss:$0 sm:$0xff] }
0x13fc   :  { %2502 = vmatprep.mubr.msk.bf16.mxu1 %vm2646_vm0, %v2645_v2  ;;  %2499 = vmatpush3.bf16.msra.mxu1 %v2554_v40 }
0x13fd   :  { %2500 = vmatprep.subr.bf16.mxu1 %v2645_v2 }
0x1400   :  { %2501 = vmatpush3.bf16.msra.mxu1 %v2555_v41 }
0x1401   :  { %2506 = vmatprep.subr.bf16.mxu1 %v2645_v2 }
0x14ce   :  { %v1810_v59 = vpop.f32.mrb[48].mxu1 }
0x14cf   :  { %v1811_v60 = vadd.f32 %v2204_v58, %v1810_v59  ;;  %v2484_v61 = vpop.f32.mrb[49].mxu1 }
0x14d0   :  { %v1813_v62 = vpop.f32.mrb[50].mxu1 }
0x14d1   :  { %v1819_v63 = vmul.f32 0.044715, %v1811_v60  ;;  %v1814_v53 = vadd.f32 %v2204_v58, %v1813_v62  ;;  %v2485_v54 = vpop.f32.mrb[51].mxu1  ;;  %v1817_v13 = vmul.f32 0.5, %v1811_v60 }
0x14d2   :  { %v2227_v54 = vld [vmem:[%s3215_s18] ss:$0 sm:$0xff] }
0x14d3   :  { %v1821_v0 = vmul.f32 %v1819_v63, %v1811_v60  ;;  %v1820_v1 = vmul.f32 0.044715, %v1814_v53  ;;  %v1818_v14 = vmul.f32 0.5, %v1814_v53  ;;  %v2556_v63 = vld [vmem:[%s3216_s19] sm:$0xff]  }
0x14d5   :  { %v1823_v3 = vmul.f32 %v1821_v0, %v1811_v60  ;;  %v1822_v4 = vmul.f32 %v1820_v1, %v1814_v53 }
0x14d7   :  { %v1825_v5 = vadd.f32 %v1823_v3, %v1811_v60  ;;  %v1824_v6 = vmul.f32 %v1822_v4, %v1814_v53 }
0x14d9   :  { %v1827_v7 = vmul.f32 0.7978846, %v1825_v5  ;;  %v1826_v8 = vadd.f32 %v1824_v6, %v1814_v53  ;;  %v2557_v53 = vld [vmem:[%s3216_s19 + $0x8] sm:$0xff]   ;;  %s2654_s19 = smov [#allocation3]  }
0x14da   :  { %s2117_s24 = sshll.u32 %s2654_s19, 4  ;;  %s2118_s24 = int_to_ptr.vmem [resolvable:$true] %s2117_s24 }
0x14db   :  { %2610 = vtanh.f32 %v1827_v7  ;;  %v1828_v9 = vmul.f32 0.7978846, %v1826_v8  ;;  %s2620_s18 = scalar_lea.vmem %s2118_s24, 32  ;;  %p2625_p1 = scmp.lt.s32.totalorder %s2118_s24, %s2118_s24 }
0x14dc   :  { %p2621_p0 = scmp.ne.s32.totalorder %s2118_s24, %s2620_s18  ;;  %p2626_p2 = scmp.lt.s32.totalorder %s2620_s18, %s2620_s18 }
0x14dd   :  { %2612 = vtanh.f32 %v1828_v9 }
0x14de   :  { %p2627_p3 = por %p2626_p2, %p2625_p1 }
0x14e0   :  { %p2628_p4 = pnand %p2627_p3, %p2621_p0 }
0x14e5   :  { %v2611_v10 = vpop.eup %2610 }
0x14e6   :  { %v1831_v11 = vadd.f32 1.0, %v2611_v10 }
0x14e7   :  { %v2613_v12 = vpop.eup %2612 }
0x14e8   :  { %v1832_v16 = vadd.f32 1.0, %v2613_v12  ;;  %v1833_v17 = vmul.f32 %v1831_v11, %v1817_v13 }
0x14ea   :  { %v1834_v18 = vmul.f32 %v1832_v16, %v1818_v14 }
0x14ec   :  { %v1835_v19 = vpack.c.bf16 %v1834_v18, %v1833_v17 }
0x14ee   :  { %2495 = vmatmul.mubr.msk.bf16.vlgmr.msra.gmra.mrb[44].mxu0 %vm1010_vm9, %v1835_v19 }
0x15c1   :  { %v1914_v21 = vpop.f32.mrb[44].mxu0 }
0x15c2   :  { %v1915_v22 = vadd.f32 %v2217_v20, %v1914_v21  ;;  %v2496_v15 = vpop.f32.mrb[45].mxu0 }
0x15c3   :  { %v1917_v26 = vpop.f32.mrb[46].mxu0 }
0x15c4   :  { %v1918_v27 = vadd.f32 %v2217_v20, %v1917_v26  ;;  %v2497_v28 = vpop.f32.mrb[47].mxu0  ;;  %v1921_v29 = vadd.f32 %v1915_v22, %v1745_v49 }
0x15c6   :  { %v1927_v25 = vsel %vm196_vm4, %v1921_v29, 0.0  ;;  %v1922_v30 = vadd.f32 %v1918_v27, %v1746_v50 }
0x15c7   :  { %1928 = vadd.xlane.f32.xlu1 %v1927_v25 }
0x15c8   :  { %v1930_v31 = vsel %vm196_vm4, %v1922_v30, 0.0 }
0x15c9   :  { %1931 = vadd.xlane.f32.xlu0 %v1930_v31 }
0x1654   :  { %v1929_v32 = vpop.xlane.xlu1 %1928 }
0x1655   :  { %v1933_v33 = vmul.f32 0.03125, %v1929_v32 }
0x1656   :  { %v1932_v23 = vpop.xlane.xlu0 %1931 }
0x1657   :  { %v1935_v24 = vsub.f32 %v1921_v29, %v1933_v33  ;;  %v1934_v34 = vmul.f32 0.03125, %v1932_v23 }
0x1659   :  { %v1936_v35 = vsub.f32 %v1922_v30, %v1934_v34  ;;  %v1937_v36 = vmul.f32 %v1935_v24, %v1935_v24 }
0x165b   :  { %v1939_v37 = vsel %vm196_vm4, %v1937_v36, 0.0  ;;  %v1938_v38 = vmul.f32 %v1936_v35, %v1936_v35 }
0x165c   :  { %1940 = vadd.xlane.f32.xlu1 %v1939_v37 }
0x165d   :  { %v1942_v39 = vsel %vm196_vm4, %v1938_v38, 0.0 }
0x165e   :  { %1943 = vadd.xlane.f32.xlu0 %v1942_v39 }
0x16e9   :  { %v1941_v42 = vpop.xlane.xlu1 %1940 }
0x16ea   :  { %v1945_v43 = vmul.f32 0.03125, %v1941_v42 }
0x16eb   :  { %v1944_v44 = vpop.xlane.xlu0 %1943 }
0x16ec   :  { %v1947_v45 = vadd.f32 1e-12, %v1945_v43  ;;  %v1946_v46 = vmul.f32 0.03125, %v1944_v44 }
0x16ee   :  { %2614 = vrsqrt.f32 %v1947_v45  ;;  %v1948_v47 = vadd.f32 1e-12, %v1946_v46 }
0x16f0   :  { %2616 = vrsqrt.f32 %v1948_v47 }
0x16f8   :  { %v2615_v48 = vpop.eup %2614 }
0x16f9   :  { %v1951_v49 = vmul.f32 %v2615_v48, %v1935_v24 }
0x16fa   :  { %v2617_v50 = vpop.eup %2616 }
0x16fb   :  { %v1952_v52 = vmul.f32 %v2617_v50, %v1936_v35  ;;  %v1959_v55 = vmul.f32 %v2225_v51, %v1951_v49 }
0x16fd   :  { %v1960_v56 = vmul.f32 %v2225_v51, %v1952_v52  ;;  %v1967_v59 = vadd.f32 %v2226_v57, %v1959_v55 }
0x16ff   :  { %v1968_v58 = vadd.f32 %v2226_v57, %v1960_v56 }
0x1701   :  { %v1970_v60 = vrot.slane %v1968_v58, 7 }
0x1703   :  { %v1973_v61 = vsel %vm1972_vm10, %v1967_v59, %v1970_v60 }
0x1704   :  { %v1974_v62 = vpack.c.bf16 %v1973_v61, %v1973_v61 }
0x1706   :  { %2503 = vmatmul.mubr.msk.bf16.vlgmr.msra.gmra.mrb[52].mxu1 %vm196_vm4, %v1974_v62 }
0x1707   :  { %2510 = vmatprep.mubr.msk.bf16.mxu1 %vm2646_vm0, %v2645_v2  ;;  %2507 = vmatpush3.bf16.msra.mxu1 %v2556_v63 }
0x1708   :  { %2508 = vmatprep.subr.bf16.mxu1 %v2645_v2  ;;  %v2231_v2 = vld [vmem:[%s3217_s20] ss:$0 sm:$0xff] }
0x170b   :  { %2509 = vmatpush3.bf16.msra.mxu1 %v2557_v53 }
0x17d9   :  { %v2035_v0 = vpop.f32.mrb[52].mxu1 }
0x17da   :  { %v2036_v1 = vadd.f32 %v2227_v54, %v2035_v0  ;;  %v2504_v3 = vpop.f32.mrb[53].mxu1 }
0x17db   :  { %v2038_v4 = vpop.f32.mrb[54].mxu1 }
0x17dc   :  { %2618 = vtanh.f32 %v2036_v1  ;;  %v2505_v5 = vpop.f32.mrb[55].mxu1 }
0x17e6   :  { %v2619_v6 = vpop.eup %2618 }
0x17e7   :  { %v2042_v7 = vpack.c.bf16 %v2619_v6, %v2619_v6 }
0x17e9   :  { %2511 = vmatmul.mubr.msk.bf16.vlgmr.msra.gmra.mrb[56].mxu1 %vm196_vm4, %v2042_v7 }
0x18bc   :  { %v2103_v8 = vpop.f32.mrb[56].mxu1 }
0x18bd   :  { %v2104_v9 = vadd.f32 %v2231_v2, %v2103_v8  ;;  %v2512_v10 = vpop.f32.mrb[57].mxu1 }
0x18be   :  { %v2106_v11 = vpop.f32.mrb[58].mxu1 }
0x18bf   :  { %v2513_v12 = vpop.f32.mrb[59].mxu1  ;;  %2110 = vst.msk [vmem:[#allocation3] sm:$0x3] %vm2109_vm11, %v2104_v9 }
0x18c0   :  { %2631 = shalt.err (!%p2628_p4)
}
0x18c1   :  { %s2632_s20 = scalar_lea.hbm %s3218_s21, 32 }
0x18c2   :  { %p2633_p5 = scmp.ne.s32.totalorder %s3218_s21, %s2632_s20  ;;  %p2636_p6 = scmp.lt.u32.totalorder %s2632_s20, %s3218_s21 }
0x18c4   :  { %p2638_p7 = pnand %p2636_p6, %p2633_p5 }
0x18c6   :  { %2641 = shalt.err (!%p2638_p7)
}
0x18c7   :  { %2120 = dma.vmem_to_hbm [thread:$0]  %s2118_s24, 32, %s3218_s21, [#allocation4]  }
0x18c8   :  { %2642 = dma.done.wait [#allocation4], 32  }
0x18c9   :  { %2643 = vsyncadd [#allocation4], 4294967264 }
0x18ca   :  { %2124 = vsyncpa [#allocation4], 1 }

</bundles_post_ra>
